<compile_context>
chip_gen: v6e
topology: v6e:2x2x1
jax: 0.10.0
libtpu: 0.0.40
codegen_flags: <defaults>
</compile_context>

<pallas_src>
import math

import jax
import jax.numpy as jnp
from jax.experimental import pallas as pl
from jax.experimental.pallas import tpu as pltpu

# ----------------------------- config ---------------------------------------
B = 2        # batch size
S = 8        # sequence length
H = 32       # hidden size
NH = 2       # attention heads
DH = H // NH # head dim
FF = 64      # FFN intermediate size
L = 2        # transformer layers
V = 100      # vocab size
P = 16       # max position embeddings
NSITES = 4   # word sites per example: 1 anchor + 3 keys
LN_EPS = 1e-12
COS_EPS = 1e-8

PARAM_ORDER = ("emb_ln_g", "emb_ln_b", "wqkv", "bqkv", "wo", "bo",
               "ln1_g", "ln1_b", "w1", "b1", "w2", "b2", "ln2_g", "ln2_b")


# ----------------------------- in-kernel helpers ----------------------------
def _layernorm(x, g, b):
    mu = jnp.mean(x, axis=-1, keepdims=True)
    var = jnp.mean((x - mu) ** 2, axis=-1, keepdims=True)
    return (x - mu) * jax.lax.rsqrt(var + LN_EPS) * g + b


def _erf(x):
    # Abramowitz & Stegun 7.1.26 rational approximation, |error| <= 1.5e-7
    # (i.e. exact to f32 precision).  Matches PyTorch's exact-erf GELU without
    # relying on an erf lowering rule inside Mosaic.
    p = 0.3275911
    a1, a2, a3, a4, a5 = (0.254829592, -0.284496736, 1.421413741,
                          -1.453152027, 1.061405429)
    sgn = jnp.where(x >= 0.0, 1.0, -1.0)
    ax = jnp.abs(x)
    t = 1.0 / (1.0 + p * ax)
    poly = ((((a5 * t + a4) * t + a3) * t + a2) * t + a1) * t
    return sgn * (1.0 - poly * jnp.exp(-ax * ax))


def _gelu_exact(x):
    # PyTorch / BERT "gelu": 0.5 * x * (1 + erf(x / sqrt(2)))  (NOT tanh approx)
    return 0.5 * x * (1.0 + _erf(x * (1.0 / math.sqrt(2.0))))


# ----------------------------- fused kernel ---------------------------------
def contrastive_bert_kernel(ws_ref,                      # SMEM: [B*NSITES] int32
                            x_ref, bias_ref, eg_ref, eb_ref,
                            wqkv_ref, bqkv_ref, wo_ref, bo_ref,
                            ln1g_ref, ln1b_ref, w1_ref, b1_ref,
                            w2_ref, b2_ref, ln2g_ref, ln2b_ref,
                            o_ref,                       # [B, NSITES-1]
                            x_s, a_s, k_s):              # VMEM scratch
    x = _layernorm(x_ref[...], eg_ref[...], eb_ref[...])   # [B*S, H]
    bias = bias_ref[...]                                    # [B, 1, S]
    scale = 1.0 / math.sqrt(DH)

    for l in range(L):                                      # unrolled, L=2
        # ---- self-attention: fused QKV projection (one MXU matmul) ----
        qkv = jnp.dot(x, wqkv_ref[l],
                      preferred_element_type=jnp.float32) + bqkv_ref[l]  # [B*S, 3H]
        q = (qkv[:, 0:H] * scale).reshape(B, S, H)
        k = qkv[:, H:2 * H].reshape(B, S, H)
        v = qkv[:, 2 * H:3 * H].reshape(B, S, H)

        # all batches handled in one batched einsum per head (no (B,NH) grid)
        ctx_heads = []
        for h in range(NH):                                 # unrolled, NH=2
            sl = slice(h * DH, (h + 1) * DH)
            s = jnp.einsum("bqd,bkd->bqk", q[:, :, sl], k[:, :, sl],
                           preferred_element_type=jnp.float32) + bias    # [B,S,S]
            m = jnp.max(s, axis=-1, keepdims=True)
            p = jnp.exp(s - m)
            p = p * pl.reciprocal(jnp.sum(p, axis=-1, keepdims=True), approx=True)
            ctx_heads.append(jnp.einsum("bqk,bkd->bqd", p, v[:, :, sl],
                                        preferred_element_type=jnp.float32))
        ctx = jnp.concatenate(ctx_heads, axis=-1).reshape(B * S, H)

        attn = jnp.dot(ctx, wo_ref[l],
                       preferred_element_type=jnp.float32) + bo_ref[l]
        x = _layernorm(x + attn, ln1g_ref[l], ln1b_ref[l])

        # ---- feed forward ----
        hid = _gelu_exact(jnp.dot(x, w1_ref[l],
                                  preferred_element_type=jnp.float32) + b1_ref[l])
        ffn = jnp.dot(hid, w2_ref[l],
                      preferred_element_type=jnp.float32) + b2_ref[l]
        x = _layernorm(x + ffn, ln2g_ref[l], ln2b_ref[l])

    # ---- word-site gather + cosine similarity, all resident in VMEM ----
    x_s[...] = x                                            # [B*S, H]
    for b in range(B):
        for j in range(NSITES):
            idx = b * S + ws_ref[b * NSITES + j]            # scalar from SMEM
            row = x_s[pl.ds(idx, 1), :]                     # [1, H] dynamic row
            if j == 0:
                a_s[pl.ds(b, 1), :] = row                   # anchor
            else:
                k_s[pl.ds(b, 1), pl.ds(j - 1, 1), :] = row[None]   # key

    a = a_s[...]                                            # [B, H]
    kv = k_s[...]                                           # [B, K, H]
    dots = jnp.sum(a[:, None, :] * kv, axis=-1)             # [B, K]
    na2 = jnp.sum(a * a, axis=-1, keepdims=True)            # [B, 1]
    nk2 = jnp.sum(kv * kv, axis=-1)                         # [B, K]
    denom = jnp.sqrt(jnp.maximum(na2 * nk2, COS_EPS * COS_EPS))
    o_ref[...] = dots / denom


def _full_spec(shape):
    idx = (0,) * len(shape)
    return pl.BlockSpec(shape, lambda i, ws, _idx=idx: _idx)


# ----------------------------- parameters -----------------------------------
def init_params(key):
    def nrm(k, shape, scale=0.02):
        return scale * jax.random.normal(k, shape, dtype=jnp.float32)

    ks = iter(jax.random.split(key, 16))
    return {
        "word_emb": nrm(next(ks), (V, H)),
        "pos_emb": nrm(next(ks), (P, H)),
        "type_emb": nrm(next(ks), (2, H)),
        "emb_ln_g": jnp.ones((1, H), jnp.float32),
        "emb_ln_b": jnp.zeros((1, H), jnp.float32),
        # per-layer params stacked on a leading L axis; Q|K|V weights fused.
        "wqkv": nrm(next(ks), (L, H, 3 * H)),
        "bqkv": jnp.zeros((L, 1, 3 * H), jnp.float32),
        "wo": nrm(next(ks), (L, H, H)),
        "bo": jnp.zeros((L, 1, H), jnp.float32),
        "ln1_g": jnp.ones((L, 1, H), jnp.float32),
        "ln1_b": jnp.zeros((L, 1, H), jnp.float32),
        "w1": nrm(next(ks), (L, H, FF)),
        "b1": jnp.zeros((L, 1, FF), jnp.float32),
        "w2": nrm(next(ks), (L, FF, H)),
        "b2": jnp.zeros((L, 1, H), jnp.float32),
        "ln2_g": jnp.ones((L, 1, H), jnp.float32),
        "ln2_b": jnp.zeros((L, 1, H), jnp.float32),
    }


# ----------------------------- forward pass ----------------------------------
def model_forward(params, word_sites, str_encoded):
    # str_encoded = (input_ids, token_type_ids, attention_mask); [0] is the
    # context ids and [2] the mask, matching the PyTorch module.
    input_ids, token_type_ids, attention_mask = str_encoded

    # Embedding-table gathers stay in plain JAX (tiny glue); everything after
    # runs inside the single fused Pallas kernel.
    pos_ids = jnp.arange(S)
    x_emb = (params["word_emb"][input_ids]
             + params["pos_emb"][pos_ids][None, :, :]
             + params["type_emb"][token_type_ids]).astype(jnp.float32)
    x_emb = x_emb.reshape(B * S, H)
    bias = ((1.0 - attention_mask.astype(jnp.float32)) * -1e9).reshape(B, 1, S)
    ws_flat = word_sites.reshape(-1).astype(jnp.int32)

    operands = [x_emb, bias] + [params[k] for k in PARAM_ORDER]
    in_specs = [_full_spec(op.shape) for op in operands]

    grid_spec = pltpu.PrefetchScalarGridSpec(
        num_scalar_prefetch=1,                    # word sites -> SMEM
        grid=(1,),
        in_specs=in_specs,
        out_specs=pl.BlockSpec((B, NSITES - 1), lambda i, ws: (0, 0)),
        scratch_shapes=[
            pltpu.VMEM((B * S, H), jnp.float32),          # final hidden states
            pltpu.VMEM((B, H), jnp.float32),              # anchor vectors
            pltpu.VMEM((B, NSITES - 1, H), jnp.float32),  # key vectors
        ],
    )

    return pl.pallas_call(
        contrastive_bert_kernel,
        out_shape=jax.ShapeDtypeStruct((B, NSITES - 1), jnp.float32),
        grid_spec=grid_spec,
        compiler_params=pltpu.CompilerParams(
            dimension_semantics=("arbitrary",)),
    )(ws_flat, *operands)


# ----------------------------- main ------------------------------------------
if __name__ == "__main__":
    root = jax.random.PRNGKey(0)
    pkey, ikey, skey = jax.random.split(root, 3)

    params = init_params(pkey)

    input_ids = jax.random.randint(ikey, (B, S), 0, V, dtype=jnp.int32)
    token_type_ids = jnp.zeros((B, S), jnp.int32)
    attention_mask = jnp.ones((B, S), jnp.int32)
    str_encoded = (input_ids, token_type_ids, attention_mask)

    # word_sites[i, 0] = anchor token index, word_sites[i, 1:] = key token indices
    word_sites = jax.random.randint(skey, (B, NSITES), 0, S, dtype=jnp.int32)

    classify_val = jax.jit(model_forward)(params, word_sites, str_encoded)
    jax.block_until_ready(classify_val)

    assert classify_val.shape == (B, NSITES - 1)
    assert classify_val.dtype == jnp.float32
    print("KERNEL_OK")
</pallas_src>

<mosaic_0001>
module attributes {stable_mosaic.version = 11 : i64} {
  func.func @contrastive_bert_kernel(%arg0: i32, %arg1: memref<8xi32, #tpu.memory_space<smem>>, %arg2: memref<16x32xf32, #tpu.memory_space<vmem>>, %arg3: memref<2x1x8xf32, #tpu.memory_space<vmem>>, %arg4: memref<1x32xf32, #tpu.memory_space<vmem>>, %arg5: memref<1x32xf32, #tpu.memory_space<vmem>>, %arg6: memref<2x32x96xf32, #tpu.memory_space<vmem>>, %arg7: memref<2x1x96xf32, #tpu.memory_space<vmem>>, %arg8: memref<2x32x32xf32, #tpu.memory_space<vmem>>, %arg9: memref<2x1x32xf32, #tpu.memory_space<vmem>>, %arg10: memref<2x1x32xf32, #tpu.memory_space<vmem>>, %arg11: memref<2x1x32xf32, #tpu.memory_space<vmem>>, %arg12: memref<2x32x64xf32, #tpu.memory_space<vmem>>, %arg13: memref<2x1x64xf32, #tpu.memory_space<vmem>>, %arg14: memref<2x64x32xf32, #tpu.memory_space<vmem>>, %arg15: memref<2x1x32xf32, #tpu.memory_space<vmem>>, %arg16: memref<2x1x32xf32, #tpu.memory_space<vmem>>, %arg17: memref<2x1x32xf32, #tpu.memory_space<vmem>>, %arg18: memref<2x3xf32, #tpu.memory_space<vmem>>, %arg19: memref<16x32xf32, #tpu.memory_space<vmem>>, %arg20: memref<2x32xf32, #tpu.memory_space<vmem>>, %arg21: memref<2x3x32xf32, #tpu.memory_space<vmem>>) attributes {dimension_semantics = [#tpu.dimension_semantics<arbitrary>], iteration_bounds = array<i64: 1>, scalar_prefetch = 1 : i64, scratch_operands = 3 : i64, tpu.core_type = #tpu.core_type<tc>, window_params = [{pipeline_mode = #tpu.pipeline_mode<synchronous>, transform_indices = @transform_0, window_bounds = array<i64: 16, 32>}, {pipeline_mode = #tpu.pipeline_mode<synchronous>, transform_indices = @transform_1, window_bounds = array<i64: 2, 1, 8>}, {pipeline_mode = #tpu.pipeline_mode<synchronous>, transform_indices = @transform_2, window_bounds = array<i64: 1, 32>}, {pipeline_mode = #tpu.pipeline_mode<synchronous>, transform_indices = @transform_3, window_bounds = array<i64: 1, 32>}, {pipeline_mode = #tpu.pipeline_mode<synchronous>, transform_indices = @transform_4, window_bounds = array<i64: 2, 32, 96>}, {pipeline_mode = #tpu.pipeline_mode<synchronous>, transform_indices = @transform_5, window_bounds = array<i64: 2, 1, 96>}, {pipeline_mode = #tpu.pipeline_mode<synchronous>, transform_indices = @transform_6, window_bounds = array<i64: 2, 32, 32>}, {pipeline_mode = #tpu.pipeline_mode<synchronous>, transform_indices = @transform_7, window_bounds = array<i64: 2, 1, 32>}, {pipeline_mode = #tpu.pipeline_mode<synchronous>, transform_indices = @transform_8, window_bounds = array<i64: 2, 1, 32>}, {pipeline_mode = #tpu.pipeline_mode<synchronous>, transform_indices = @transform_9, window_bounds = array<i64: 2, 1, 32>}, {pipeline_mode = #tpu.pipeline_mode<synchronous>, transform_indices = @transform_10, window_bounds = array<i64: 2, 32, 64>}, {pipeline_mode = #tpu.pipeline_mode<synchronous>, transform_indices = @transform_11, window_bounds = array<i64: 2, 1, 64>}, {pipeline_mode = #tpu.pipeline_mode<synchronous>, transform_indices = @transform_12, window_bounds = array<i64: 2, 64, 32>}, {pipeline_mode = #tpu.pipeline_mode<synchronous>, transform_indices = @transform_13, window_bounds = array<i64: 2, 1, 32>}, {pipeline_mode = #tpu.pipeline_mode<synchronous>, transform_indices = @transform_14, window_bounds = array<i64: 2, 1, 32>}, {pipeline_mode = #tpu.pipeline_mode<synchronous>, transform_indices = @transform_15, window_bounds = array<i64: 2, 1, 32>}, {pipeline_mode = #tpu.pipeline_mode<synchronous>, transform_indices = @transform_16, window_bounds = array<i64: 2, 3>}]} {
    %c0 = arith.constant 0 : index
    %c0_0 = arith.constant 0 : index
    %0 = vector.load %arg2[%c0, %c0_0] : memref<16x32xf32, #tpu.memory_space<vmem>>, vector<16x32xf32>
    %c0_1 = arith.constant 0 : index
    %c0_2 = arith.constant 0 : index
    %1 = vector.load %arg4[%c0_1, %c0_2] : memref<1x32xf32, #tpu.memory_space<vmem>>, vector<1x32xf32>
    %c0_3 = arith.constant 0 : index
    %c0_4 = arith.constant 0 : index
    %2 = vector.load %arg5[%c0_3, %c0_4] : memref<1x32xf32, #tpu.memory_space<vmem>>, vector<1x32xf32>
    %cst = arith.constant dense<0.000000e+00> : vector<16xf32>
    %3 = vector.multi_reduction <add>, %0, %cst [1] : vector<16x32xf32> to vector<16xf32>
    %4 = vector.shape_cast %3 : vector<16xf32> to vector<16x1xf32>
    %cst_5 = arith.constant 3.200000e+01 : f32
    %5 = vector.broadcast %cst_5 : f32 to vector<16x1xf32>
    %6 = arith.divf %4, %5 : vector<16x1xf32>
    %7 = vector.broadcast %6 : vector<16x1xf32> to vector<16x32xf32>
    %8 = arith.subf %0, %7 : vector<16x32xf32>
    %9 = arith.mulf %8, %8 : vector<16x32xf32>
    %cst_6 = arith.constant dense<0.000000e+00> : vector<16xf32>
    %10 = vector.multi_reduction <add>, %9, %cst_6 [1] : vector<16x32xf32> to vector<16xf32>
    %11 = vector.shape_cast %10 : vector<16xf32> to vector<16x1xf32>
    %cst_7 = arith.constant 3.200000e+01 : f32
    %12 = vector.broadcast %cst_7 : f32 to vector<16x1xf32>
    %13 = arith.divf %11, %12 : vector<16x1xf32>
    %14 = vector.broadcast %6 : vector<16x1xf32> to vector<16x32xf32>
    %15 = arith.subf %0, %14 : vector<16x32xf32>
    %cst_8 = arith.constant 9.99999996E-13 : f32
    %16 = vector.broadcast %cst_8 : f32 to vector<16x1xf32>
    %17 = arith.addf %13, %16 : vector<16x1xf32>
    %18 = math.rsqrt %17 : vector<16x1xf32>
    %19 = vector.broadcast %18 : vector<16x1xf32> to vector<16x32xf32>
    %20 = arith.mulf %15, %19 : vector<16x32xf32>
    %21 = vector.broadcast %1 : vector<1x32xf32> to vector<16x32xf32>
    %22 = arith.mulf %20, %21 : vector<16x32xf32>
    %23 = vector.broadcast %2 : vector<1x32xf32> to vector<16x32xf32>
    %24 = arith.addf %22, %23 : vector<16x32xf32>
    %c0_9 = arith.constant 0 : index
    %c0_10 = arith.constant 0 : index
    %c0_11 = arith.constant 0 : index
    %25 = vector.load %arg3[%c0_9, %c0_10, %c0_11] : memref<2x1x8xf32, #tpu.memory_space<vmem>>, vector<2x1x8xf32>
    %c0_12 = arith.constant 0 : index
    %c0_13 = arith.constant 0 : index
    %c0_14 = arith.constant 0 : index
    %26 = vector.load %arg6[%c0_12, %c0_13, %c0_14] : memref<2x32x96xf32, #tpu.memory_space<vmem>>, vector<1x32x96xf32>
    %27 = vector.shape_cast %26 : vector<1x32x96xf32> to vector<32x96xf32>
    %cst_15 = arith.constant dense<0.000000e+00> : vector<16x96xf32>
    %28 = tpu.matmul %24, %27, %cst_15 {dimension_numbers = #tpu.dot_dimension_numbers<[1], [0], [0], [1], [0, 0, 1, 1], [], []>} : vector<16x32xf32>, vector<32x96xf32>, vector<16x96xf32> -> vector<16x96xf32>
    %c0_16 = arith.constant 0 : index
    %c0_17 = arith.constant 0 : index
    %c0_18 = arith.constant 0 : index
    %29 = vector.load %arg7[%c0_16, %c0_17, %c0_18] : memref<2x1x96xf32, #tpu.memory_space<vmem>>, vector<1x1x96xf32>
    %30 = vector.shape_cast %29 : vector<1x1x96xf32> to vector<1x96xf32>
    %31 = vector.broadcast %30 : vector<1x96xf32> to vector<16x96xf32>
    %32 = arith.addf %28, %31 : vector<16x96xf32>
    %33 = vector.extract_strided_slice %32 {offsets = [0, 0], sizes = [16, 32], strides = [1, 1]} : vector<16x96xf32> to vector<16x32xf32>
    %cst_19 = arith.constant 2.500000e-01 : f32
    %34 = vector.broadcast %cst_19 : f32 to vector<16x32xf32>
    %35 = arith.mulf %33, %34 : vector<16x32xf32>
    %36 = vector.shape_cast %35 : vector<16x32xf32> to vector<2x8x32xf32>
    %37 = vector.extract_strided_slice %32 {offsets = [0, 32], sizes = [16, 32], strides = [1, 1]} : vector<16x96xf32> to vector<16x32xf32>
    %38 = vector.shape_cast %37 : vector<16x32xf32> to vector<2x8x32xf32>
    %39 = vector.extract_strided_slice %32 {offsets = [0, 64], sizes = [16, 32], strides = [1, 1]} : vector<16x96xf32> to vector<16x32xf32>
    %40 = vector.shape_cast %39 : vector<16x32xf32> to vector<2x8x32xf32>
    %41 = vector.extract_strided_slice %36 {offsets = [0, 0, 0], sizes = [2, 8, 16], strides = [1, 1, 1]} : vector<2x8x32xf32> to vector<2x8x16xf32>
    %42 = vector.extract_strided_slice %38 {offsets = [0, 0, 0], sizes = [2, 8, 16], strides = [1, 1, 1]} : vector<2x8x32xf32> to vector<2x8x16xf32>
    "tpu.trace_start"() <{level = 10 : i32, message = "bqd,bkd->bqk"}> : () -> ()
    %cst_20 = arith.constant dense<0.000000e+00> : vector<2x8x8xf32>
    %43 = tpu.matmul %41, %42, %cst_20 {dimension_numbers = #tpu.dot_dimension_numbers<[2], [2], [1], [1], [0, 0, 0, 1, 1, 1], [0], [0]>} : vector<2x8x16xf32>, vector<2x8x16xf32>, vector<2x8x8xf32> -> vector<2x8x8xf32>
    "tpu.trace_stop"() : () -> ()
    %44 = vector.broadcast %25 : vector<2x1x8xf32> to vector<2x8x8xf32>
    %45 = arith.addf %43, %44 : vector<2x8x8xf32>
    %cst_21 = arith.constant dense<0xFF800000> : vector<2x8xf32>
    %46 = vector.multi_reduction <maximumf>, %45, %cst_21 [2] : vector<2x8x8xf32> to vector<2x8xf32>
    %47 = vector.shape_cast %46 : vector<2x8xf32> to vector<2x8x1xf32>
    %48 = vector.broadcast %47 : vector<2x8x1xf32> to vector<2x8x8xf32>
    %49 = arith.subf %45, %48 : vector<2x8x8xf32>
    %50 = math.exp %49 : vector<2x8x8xf32>
    %cst_22 = arith.constant dense<0.000000e+00> : vector<2x8xf32>
    %51 = vector.multi_reduction <add>, %50, %cst_22 [2] : vector<2x8x8xf32> to vector<2x8xf32>
    %52 = vector.shape_cast %51 : vector<2x8xf32> to vector<2x8x1xf32>
    %53 = tpu.reciprocal %52 {approx = true} : vector<2x8x1xf32> -> vector<2x8x1xf32>
    %54 = vector.broadcast %53 : vector<2x8x1xf32> to vector<2x8x8xf32>
    %55 = arith.mulf %50, %54 : vector<2x8x8xf32>
    %56 = vector.extract_strided_slice %40 {offsets = [0, 0, 0], sizes = [2, 8, 16], strides = [1, 1, 1]} : vector<2x8x32xf32> to vector<2x8x16xf32>
    "tpu.trace_start"() <{level = 10 : i32, message = "bqk,bkd->bqd"}> : () -> ()
    %cst_23 = arith.constant dense<0.000000e+00> : vector<2x8x16xf32>
    %57 = tpu.matmul %55, %56, %cst_23 {dimension_numbers = #tpu.dot_dimension_numbers<[2], [1], [1], [2], [0, 0, 0, 1, 1, 2], [0], [0]>} : vector<2x8x8xf32>, vector<2x8x16xf32>, vector<2x8x16xf32> -> vector<2x8x16xf32>
    "tpu.trace_stop"() : () -> ()
    %58 = vector.extract_strided_slice %36 {offsets = [0, 0, 16], sizes = [2, 8, 16], strides = [1, 1, 1]} : vector<2x8x32xf32> to vector<2x8x16xf32>
    %59 = vector.extract_strided_slice %38 {offsets = [0, 0, 16], sizes = [2, 8, 16], strides = [1, 1, 1]} : vector<2x8x32xf32> to vector<2x8x16xf32>
    "tpu.trace_start"() <{level = 10 : i32, message = "bqd,bkd->bqk"}> : () -> ()
    %cst_24 = arith.constant dense<0.000000e+00> : vector<2x8x8xf32>
    %60 = tpu.matmul %58, %59, %cst_24 {dimension_numbers = #tpu.dot_dimension_numbers<[2], [2], [1], [1], [0, 0, 0, 1, 1, 1], [0], [0]>} : vector<2x8x16xf32>, vector<2x8x16xf32>, vector<2x8x8xf32> -> vector<2x8x8xf32>
    "tpu.trace_stop"() : () -> ()
    %61 = vector.broadcast %25 : vector<2x1x8xf32> to vector<2x8x8xf32>
    %62 = arith.addf %60, %61 : vector<2x8x8xf32>
    %cst_25 = arith.constant dense<0xFF800000> : vector<2x8xf32>
    %63 = vector.multi_reduction <maximumf>, %62, %cst_25 [2] : vector<2x8x8xf32> to vector<2x8xf32>
    %64 = vector.shape_cast %63 : vector<2x8xf32> to vector<2x8x1xf32>
    %65 = vector.broadcast %64 : vector<2x8x1xf32> to vector<2x8x8xf32>
    %66 = arith.subf %62, %65 : vector<2x8x8xf32>
    %67 = math.exp %66 : vector<2x8x8xf32>
    %cst_26 = arith.constant dense<0.000000e+00> : vector<2x8xf32>
    %68 = vector.multi_reduction <add>, %67, %cst_26 [2] : vector<2x8x8xf32> to vector<2x8xf32>
    %69 = vector.shape_cast %68 : vector<2x8xf32> to vector<2x8x1xf32>
    %70 = tpu.reciprocal %69 {approx = true} : vector<2x8x1xf32> -> vector<2x8x1xf32>
    %71 = vector.broadcast %70 : vector<2x8x1xf32> to vector<2x8x8xf32>
    %72 = arith.mulf %67, %71 : vector<2x8x8xf32>
    %73 = vector.extract_strided_slice %40 {offsets = [0, 0, 16], sizes = [2, 8, 16], strides = [1, 1, 1]} : vector<2x8x32xf32> to vector<2x8x16xf32>
    "tpu.trace_start"() <{level = 10 : i32, message = "bqk,bkd->bqd"}> : () -> ()
    %cst_27 = arith.constant dense<0.000000e+00> : vector<2x8x16xf32>
    %74 = tpu.matmul %72, %73, %cst_27 {dimension_numbers = #tpu.dot_dimension_numbers<[2], [1], [1], [2], [0, 0, 0, 1, 1, 2], [0], [0]>} : vector<2x8x8xf32>, vector<2x8x16xf32>, vector<2x8x16xf32> -> vector<2x8x16xf32>
    "tpu.trace_stop"() : () -> ()
    %75 = tpu.concatenate %57, %74 in 2 : vector<2x8x16xf32>, vector<2x8x16xf32> -> vector<2x8x32xf32>
    %76 = vector.shape_cast %75 : vector<2x8x32xf32> to vector<16x32xf32>
    %c0_28 = arith.constant 0 : index
    %c0_29 = arith.constant 0 : index
    %c0_30 = arith.constant 0 : index
    %77 = vector.load %arg8[%c0_28, %c0_29, %c0_30] : memref<2x32x32xf32, #tpu.memory_space<vmem>>, vector<1x32x32xf32>
    %78 = vector.shape_cast %77 : vector<1x32x32xf32> to vector<32x32xf32>
    %cst_31 = arith.constant dense<0.000000e+00> : vector<16x32xf32>
    %79 = tpu.matmul %76, %78, %cst_31 {dimension_numbers = #tpu.dot_dimension_numbers<[1], [0], [0], [1], [0, 0, 1, 1], [], []>} : vector<16x32xf32>, vector<32x32xf32>, vector<16x32xf32> -> vector<16x32xf32>
    %c0_32 = arith.constant 0 : index
    %c0_33 = arith.constant 0 : index
    %c0_34 = arith.constant 0 : index
    %80 = vector.load %arg9[%c0_32, %c0_33, %c0_34] : memref<2x1x32xf32, #tpu.memory_space<vmem>>, vector<1x1x32xf32>
    %81 = vector.shape_cast %80 : vector<1x1x32xf32> to vector<1x32xf32>
    %82 = vector.broadcast %81 : vector<1x32xf32> to vector<16x32xf32>
    %83 = arith.addf %79, %82 : vector<16x32xf32>
    %84 = arith.addf %24, %83 : vector<16x32xf32>
    %c0_35 = arith.constant 0 : index
    %c0_36 = arith.constant 0 : index
    %c0_37 = arith.constant 0 : index
    %85 = vector.load %arg10[%c0_35, %c0_36, %c0_37] : memref<2x1x32xf32, #tpu.memory_space<vmem>>, vector<1x1x32xf32>
    %86 = vector.shape_cast %85 : vector<1x1x32xf32> to vector<1x32xf32>
    %c0_38 = arith.constant 0 : index
    %c0_39 = arith.constant 0 : index
    %c0_40 = arith.constant 0 : index
    %87 = vector.load %arg11[%c0_38, %c0_39, %c0_40] : memref<2x1x32xf32, #tpu.memory_space<vmem>>, vector<1x1x32xf32>
    %88 = vector.shape_cast %87 : vector<1x1x32xf32> to vector<1x32xf32>
    %cst_41 = arith.constant dense<0.000000e+00> : vector<16xf32>
    %89 = vector.multi_reduction <add>, %84, %cst_41 [1] : vector<16x32xf32> to vector<16xf32>
    %90 = vector.shape_cast %89 : vector<16xf32> to vector<16x1xf32>
    %cst_42 = arith.constant 3.200000e+01 : f32
    %91 = vector.broadcast %cst_42 : f32 to vector<16x1xf32>
    %92 = arith.divf %90, %91 : vector<16x1xf32>
    %93 = vector.broadcast %92 : vector<16x1xf32> to vector<16x32xf32>
    %94 = arith.subf %84, %93 : vector<16x32xf32>
    %95 = arith.mulf %94, %94 : vector<16x32xf32>
    %cst_43 = arith.constant dense<0.000000e+00> : vector<16xf32>
    %96 = vector.multi_reduction <add>, %95, %cst_43 [1] : vector<16x32xf32> to vector<16xf32>
    %97 = vector.shape_cast %96 : vector<16xf32> to vector<16x1xf32>
    %cst_44 = arith.constant 3.200000e+01 : f32
    %98 = vector.broadcast %cst_44 : f32 to vector<16x1xf32>
    %99 = arith.divf %97, %98 : vector<16x1xf32>
    %100 = vector.broadcast %92 : vector<16x1xf32> to vector<16x32xf32>
    %101 = arith.subf %84, %100 : vector<16x32xf32>
    %cst_45 = arith.constant 9.99999996E-13 : f32
    %102 = vector.broadcast %cst_45 : f32 to vector<16x1xf32>
    %103 = arith.addf %99, %102 : vector<16x1xf32>
    %104 = math.rsqrt %103 : vector<16x1xf32>
    %105 = vector.broadcast %104 : vector<16x1xf32> to vector<16x32xf32>
    %106 = arith.mulf %101, %105 : vector<16x32xf32>
    %107 = vector.broadcast %86 : vector<1x32xf32> to vector<16x32xf32>
    %108 = arith.mulf %106, %107 : vector<16x32xf32>
    %109 = vector.broadcast %88 : vector<1x32xf32> to vector<16x32xf32>
    %110 = arith.addf %108, %109 : vector<16x32xf32>
    %c0_46 = arith.constant 0 : index
    %c0_47 = arith.constant 0 : index
    %c0_48 = arith.constant 0 : index
    %111 = vector.load %arg12[%c0_46, %c0_47, %c0_48] : memref<2x32x64xf32, #tpu.memory_space<vmem>>, vector<1x32x64xf32>
    %112 = vector.shape_cast %111 : vector<1x32x64xf32> to vector<32x64xf32>
    %cst_49 = arith.constant dense<0.000000e+00> : vector<16x64xf32>
    %113 = tpu.matmul %110, %112, %cst_49 {dimension_numbers = #tpu.dot_dimension_numbers<[1], [0], [0], [1], [0, 0, 1, 1], [], []>} : vector<16x32xf32>, vector<32x64xf32>, vector<16x64xf32> -> vector<16x64xf32>
    %c0_50 = arith.constant 0 : index
    %c0_51 = arith.constant 0 : index
    %c0_52 = arith.constant 0 : index
    %114 = vector.load %arg13[%c0_50, %c0_51, %c0_52] : memref<2x1x64xf32, #tpu.memory_space<vmem>>, vector<1x1x64xf32>
    %115 = vector.shape_cast %114 : vector<1x1x64xf32> to vector<1x64xf32>
    %116 = vector.broadcast %115 : vector<1x64xf32> to vector<16x64xf32>
    %117 = arith.addf %113, %116 : vector<16x64xf32>
    %cst_53 = arith.constant 5.000000e-01 : f32
    %118 = vector.broadcast %cst_53 : f32 to vector<16x64xf32>
    %119 = arith.mulf %118, %117 : vector<16x64xf32>
    %cst_54 = arith.constant 0.707106769 : f32
    %120 = vector.broadcast %cst_54 : f32 to vector<16x64xf32>
    %121 = arith.mulf %117, %120 : vector<16x64xf32>
    %cst_55 = arith.constant 0.000000e+00 : f32
    %122 = vector.broadcast %cst_55 : f32 to vector<16x64xf32>
    %123 = arith.cmpf oge, %121, %122 : vector<16x64xf32>
    %cst_56 = arith.constant 1.000000e+00 : f32
    %cst_57 = arith.constant -1.000000e+00 : f32
    %124 = vector.broadcast %cst_56 : f32 to vector<16x64xf32>
    %125 = vector.broadcast %cst_57 : f32 to vector<16x64xf32>
    %126 = arith.select %123, %124, %125 : vector<16x64xi1>, vector<16x64xf32>
    %127 = math.absf %121 : vector<16x64xf32>
    %cst_58 = arith.constant 0.327591091 : f32
    %128 = vector.broadcast %cst_58 : f32 to vector<16x64xf32>
    %129 = arith.mulf %128, %127 : vector<16x64xf32>
    %cst_59 = arith.constant 1.000000e+00 : f32
    %130 = vector.broadcast %cst_59 : f32 to vector<16x64xf32>
    %131 = arith.addf %130, %129 : vector<16x64xf32>
    %cst_60 = arith.constant 1.000000e+00 : f32
    %132 = vector.broadcast %cst_60 : f32 to vector<16x64xf32>
    %133 = arith.divf %132, %131 : vector<16x64xf32>
    %cst_61 = arith.constant 1.06140542 : f32
    %134 = vector.broadcast %cst_61 : f32 to vector<16x64xf32>
    %135 = arith.mulf %134, %133 : vector<16x64xf32>
    %cst_62 = arith.constant -1.45315206 : f32
    %136 = vector.broadcast %cst_62 : f32 to vector<16x64xf32>
    %137 = arith.addf %135, %136 : vector<16x64xf32>
    %138 = arith.mulf %137, %133 : vector<16x64xf32>
    %cst_63 = arith.constant 1.42141378 : f32
    %139 = vector.broadcast %cst_63 : f32 to vector<16x64xf32>
    %140 = arith.addf %138, %139 : vector<16x64xf32>
    %141 = arith.mulf %140, %133 : vector<16x64xf32>
    %cst_64 = arith.constant -0.284496725 : f32
    %142 = vector.broadcast %cst_64 : f32 to vector<16x64xf32>
    %143 = arith.addf %141, %142 : vector<16x64xf32>
    %144 = arith.mulf %143, %133 : vector<16x64xf32>
    %cst_65 = arith.constant 0.254829586 : f32
    %145 = vector.broadcast %cst_65 : f32 to vector<16x64xf32>
    %146 = arith.addf %144, %145 : vector<16x64xf32>
    %147 = arith.mulf %146, %133 : vector<16x64xf32>
    %cst_66 = arith.constant 0.000000e+00 : f32
    %148 = vector.broadcast %cst_66 : f32 to vector<16x64xf32>
    %149 = arith.subf %148, %127 : vector<16x64xf32>
    %150 = arith.mulf %149, %127 : vector<16x64xf32>
    %151 = math.exp %150 : vector<16x64xf32>
    %152 = arith.mulf %147, %151 : vector<16x64xf32>
    %cst_67 = arith.constant 1.000000e+00 : f32
    %153 = vector.broadcast %cst_67 : f32 to vector<16x64xf32>
    %154 = arith.subf %153, %152 : vector<16x64xf32>
    %155 = arith.mulf %126, %154 : vector<16x64xf32>
    %cst_68 = arith.constant 1.000000e+00 : f32
    %156 = vector.broadcast %cst_68 : f32 to vector<16x64xf32>
    %157 = arith.addf %156, %155 : vector<16x64xf32>
    %158 = arith.mulf %119, %157 : vector<16x64xf32>
    %c0_69 = arith.constant 0 : index
    %c0_70 = arith.constant 0 : index
    %c0_71 = arith.constant 0 : index
    %159 = vector.load %arg14[%c0_69, %c0_70, %c0_71] : memref<2x64x32xf32, #tpu.memory_space<vmem>>, vector<1x64x32xf32>
    %160 = vector.shape_cast %159 : vector<1x64x32xf32> to vector<64x32xf32>
    %cst_72 = arith.constant dense<0.000000e+00> : vector<16x32xf32>
    %161 = tpu.matmul %158, %160, %cst_72 {dimension_numbers = #tpu.dot_dimension_numbers<[1], [0], [0], [1], [0, 0, 1, 1], [], []>} : vector<16x64xf32>, vector<64x32xf32>, vector<16x32xf32> -> vector<16x32xf32>
    %c0_73 = arith.constant 0 : index
    %c0_74 = arith.constant 0 : index
    %c0_75 = arith.constant 0 : index
    %162 = vector.load %arg15[%c0_73, %c0_74, %c0_75] : memref<2x1x32xf32, #tpu.memory_space<vmem>>, vector<1x1x32xf32>
    %163 = vector.shape_cast %162 : vector<1x1x32xf32> to vector<1x32xf32>
    %164 = vector.broadcast %163 : vector<1x32xf32> to vector<16x32xf32>
    %165 = arith.addf %161, %164 : vector<16x32xf32>
    %166 = arith.addf %110, %165 : vector<16x32xf32>
    %c0_76 = arith.constant 0 : index
    %c0_77 = arith.constant 0 : index
    %c0_78 = arith.constant 0 : index
    %167 = vector.load %arg16[%c0_76, %c0_77, %c0_78] : memref<2x1x32xf32, #tpu.memory_space<vmem>>, vector<1x1x32xf32>
    %168 = vector.shape_cast %167 : vector<1x1x32xf32> to vector<1x32xf32>
    %c0_79 = arith.constant 0 : index
    %c0_80 = arith.constant 0 : index
    %c0_81 = arith.constant 0 : index
    %169 = vector.load %arg17[%c0_79, %c0_80, %c0_81] : memref<2x1x32xf32, #tpu.memory_space<vmem>>, vector<1x1x32xf32>
    %170 = vector.shape_cast %169 : vector<1x1x32xf32> to vector<1x32xf32>
    %cst_82 = arith.constant dense<0.000000e+00> : vector<16xf32>
    %171 = vector.multi_reduction <add>, %166, %cst_82 [1] : vector<16x32xf32> to vector<16xf32>
    %172 = vector.shape_cast %171 : vector<16xf32> to vector<16x1xf32>
    %cst_83 = arith.constant 3.200000e+01 : f32
    %173 = vector.broadcast %cst_83 : f32 to vector<16x1xf32>
    %174 = arith.divf %172, %173 : vector<16x1xf32>
    %175 = vector.broadcast %174 : vector<16x1xf32> to vector<16x32xf32>
    %176 = arith.subf %166, %175 : vector<16x32xf32>
    %177 = arith.mulf %176, %176 : vector<16x32xf32>
    %cst_84 = arith.constant dense<0.000000e+00> : vector<16xf32>
    %178 = vector.multi_reduction <add>, %177, %cst_84 [1] : vector<16x32xf32> to vector<16xf32>
    %179 = vector.shape_cast %178 : vector<16xf32> to vector<16x1xf32>
    %cst_85 = arith.constant 3.200000e+01 : f32
    %180 = vector.broadcast %cst_85 : f32 to vector<16x1xf32>
    %181 = arith.divf %179, %180 : vector<16x1xf32>
    %182 = vector.broadcast %174 : vector<16x1xf32> to vector<16x32xf32>
    %183 = arith.subf %166, %182 : vector<16x32xf32>
    %cst_86 = arith.constant 9.99999996E-13 : f32
    %184 = vector.broadcast %cst_86 : f32 to vector<16x1xf32>
    %185 = arith.addf %181, %184 : vector<16x1xf32>
    %186 = math.rsqrt %185 : vector<16x1xf32>
    %187 = vector.broadcast %186 : vector<16x1xf32> to vector<16x32xf32>
    %188 = arith.mulf %183, %187 : vector<16x32xf32>
    %189 = vector.broadcast %168 : vector<1x32xf32> to vector<16x32xf32>
    %190 = arith.mulf %188, %189 : vector<16x32xf32>
    %191 = vector.broadcast %170 : vector<1x32xf32> to vector<16x32xf32>
    %192 = arith.addf %190, %191 : vector<16x32xf32>
    %c1 = arith.constant 1 : index
    %c0_87 = arith.constant 0 : index
    %c0_88 = arith.constant 0 : index
    %193 = vector.load %arg6[%c1, %c0_87, %c0_88] : memref<2x32x96xf32, #tpu.memory_space<vmem>>, vector<1x32x96xf32>
    %194 = vector.shape_cast %193 : vector<1x32x96xf32> to vector<32x96xf32>
    %cst_89 = arith.constant dense<0.000000e+00> : vector<16x96xf32>
    %195 = tpu.matmul %192, %194, %cst_89 {dimension_numbers = #tpu.dot_dimension_numbers<[1], [0], [0], [1], [0, 0, 1, 1], [], []>} : vector<16x32xf32>, vector<32x96xf32>, vector<16x96xf32> -> vector<16x96xf32>
    %c1_90 = arith.constant 1 : index
    %c0_91 = arith.constant 0 : index
    %c0_92 = arith.constant 0 : index
    %196 = vector.load %arg7[%c1_90, %c0_91, %c0_92] : memref<2x1x96xf32, #tpu.memory_space<vmem>>, vector<1x1x96xf32>
    %197 = vector.shape_cast %196 : vector<1x1x96xf32> to vector<1x96xf32>
    %198 = vector.broadcast %197 : vector<1x96xf32> to vector<16x96xf32>
    %199 = arith.addf %195, %198 : vector<16x96xf32>
    %200 = vector.extract_strided_slice %199 {offsets = [0, 0], sizes = [16, 32], strides = [1, 1]} : vector<16x96xf32> to vector<16x32xf32>
    %cst_93 = arith.constant 2.500000e-01 : f32
    %201 = vector.broadcast %cst_93 : f32 to vector<16x32xf32>
    %202 = arith.mulf %200, %201 : vector<16x32xf32>
    %203 = vector.shape_cast %202 : vector<16x32xf32> to vector<2x8x32xf32>
    %204 = vector.extract_strided_slice %199 {offsets = [0, 32], sizes = [16, 32], strides = [1, 1]} : vector<16x96xf32> to vector<16x32xf32>
    %205 = vector.shape_cast %204 : vector<16x32xf32> to vector<2x8x32xf32>
    %206 = vector.extract_strided_slice %199 {offsets = [0, 64], sizes = [16, 32], strides = [1, 1]} : vector<16x96xf32> to vector<16x32xf32>
    %207 = vector.shape_cast %206 : vector<16x32xf32> to vector<2x8x32xf32>
    %208 = vector.extract_strided_slice %203 {offsets = [0, 0, 0], sizes = [2, 8, 16], strides = [1, 1, 1]} : vector<2x8x32xf32> to vector<2x8x16xf32>
    %209 = vector.extract_strided_slice %205 {offsets = [0, 0, 0], sizes = [2, 8, 16], strides = [1, 1, 1]} : vector<2x8x32xf32> to vector<2x8x16xf32>
    "tpu.trace_start"() <{level = 10 : i32, message = "bqd,bkd->bqk"}> : () -> ()
    %cst_94 = arith.constant dense<0.000000e+00> : vector<2x8x8xf32>
    %210 = tpu.matmul %208, %209, %cst_94 {dimension_numbers = #tpu.dot_dimension_numbers<[2], [2], [1], [1], [0, 0, 0, 1, 1, 1], [0], [0]>} : vector<2x8x16xf32>, vector<2x8x16xf32>, vector<2x8x8xf32> -> vector<2x8x8xf32>
    "tpu.trace_stop"() : () -> ()
    %211 = vector.broadcast %25 : vector<2x1x8xf32> to vector<2x8x8xf32>
    %212 = arith.addf %210, %211 : vector<2x8x8xf32>
    %cst_95 = arith.constant dense<0xFF800000> : vector<2x8xf32>
    %213 = vector.multi_reduction <maximumf>, %212, %cst_95 [2] : vector<2x8x8xf32> to vector<2x8xf32>
    %214 = vector.shape_cast %213 : vector<2x8xf32> to vector<2x8x1xf32>
    %215 = vector.broadcast %214 : vector<2x8x1xf32> to vector<2x8x8xf32>
    %216 = arith.subf %212, %215 : vector<2x8x8xf32>
    %217 = math.exp %216 : vector<2x8x8xf32>
    %cst_96 = arith.constant dense<0.000000e+00> : vector<2x8xf32>
    %218 = vector.multi_reduction <add>, %217, %cst_96 [2] : vector<2x8x8xf32> to vector<2x8xf32>
    %219 = vector.shape_cast %218 : vector<2x8xf32> to vector<2x8x1xf32>
    %220 = tpu.reciprocal %219 {approx = true} : vector<2x8x1xf32> -> vector<2x8x1xf32>
    %221 = vector.broadcast %220 : vector<2x8x1xf32> to vector<2x8x8xf32>
    %222 = arith.mulf %217, %221 : vector<2x8x8xf32>
    %223 = vector.extract_strided_slice %207 {offsets = [0, 0, 0], sizes = [2, 8, 16], strides = [1, 1, 1]} : vector<2x8x32xf32> to vector<2x8x16xf32>
    "tpu.trace_start"() <{level = 10 : i32, message = "bqk,bkd->bqd"}> : () -> ()
    %cst_97 = arith.constant dense<0.000000e+00> : vector<2x8x16xf32>
    %224 = tpu.matmul %222, %223, %cst_97 {dimension_numbers = #tpu.dot_dimension_numbers<[2], [1], [1], [2], [0, 0, 0, 1, 1, 2], [0], [0]>} : vector<2x8x8xf32>, vector<2x8x16xf32>, vector<2x8x16xf32> -> vector<2x8x16xf32>
    "tpu.trace_stop"() : () -> ()
    %225 = vector.extract_strided_slice %203 {offsets = [0, 0, 16], sizes = [2, 8, 16], strides = [1, 1, 1]} : vector<2x8x32xf32> to vector<2x8x16xf32>
    %226 = vector.extract_strided_slice %205 {offsets = [0, 0, 16], sizes = [2, 8, 16], strides = [1, 1, 1]} : vector<2x8x32xf32> to vector<2x8x16xf32>
    "tpu.trace_start"() <{level = 10 : i32, message = "bqd,bkd->bqk"}> : () -> ()
    %cst_98 = arith.constant dense<0.000000e+00> : vector<2x8x8xf32>
    %227 = tpu.matmul %225, %226, %cst_98 {dimension_numbers = #tpu.dot_dimension_numbers<[2], [2], [1], [1], [0, 0, 0, 1, 1, 1], [0], [0]>} : vector<2x8x16xf32>, vector<2x8x16xf32>, vector<2x8x8xf32> -> vector<2x8x8xf32>
    "tpu.trace_stop"() : () -> ()
    %228 = vector.broadcast %25 : vector<2x1x8xf32> to vector<2x8x8xf32>
    %229 = arith.addf %227, %228 : vector<2x8x8xf32>
    %cst_99 = arith.constant dense<0xFF800000> : vector<2x8xf32>
    %230 = vector.multi_reduction <maximumf>, %229, %cst_99 [2] : vector<2x8x8xf32> to vector<2x8xf32>
    %231 = vector.shape_cast %230 : vector<2x8xf32> to vector<2x8x1xf32>
    %232 = vector.broadcast %231 : vector<2x8x1xf32> to vector<2x8x8xf32>
    %233 = arith.subf %229, %232 : vector<2x8x8xf32>
    %234 = math.exp %233 : vector<2x8x8xf32>
    %cst_100 = arith.constant dense<0.000000e+00> : vector<2x8xf32>
    %235 = vector.multi_reduction <add>, %234, %cst_100 [2] : vector<2x8x8xf32> to vector<2x8xf32>
    %236 = vector.shape_cast %235 : vector<2x8xf32> to vector<2x8x1xf32>
    %237 = tpu.reciprocal %236 {approx = true} : vector<2x8x1xf32> -> vector<2x8x1xf32>
    %238 = vector.broadcast %237 : vector<2x8x1xf32> to vector<2x8x8xf32>
    %239 = arith.mulf %234, %238 : vector<2x8x8xf32>
    %240 = vector.extract_strided_slice %207 {offsets = [0, 0, 16], sizes = [2, 8, 16], strides = [1, 1, 1]} : vector<2x8x32xf32> to vector<2x8x16xf32>
    "tpu.trace_start"() <{level = 10 : i32, message = "bqk,bkd->bqd"}> : () -> ()
    %cst_101 = arith.constant dense<0.000000e+00> : vector<2x8x16xf32>
    %241 = tpu.matmul %239, %240, %cst_101 {dimension_numbers = #tpu.dot_dimension_numbers<[2], [1], [1], [2], [0, 0, 0, 1, 1, 2], [0], [0]>} : vector<2x8x8xf32>, vector<2x8x16xf32>, vector<2x8x16xf32> -> vector<2x8x16xf32>
    "tpu.trace_stop"() : () -> ()
    %242 = tpu.concatenate %224, %241 in 2 : vector<2x8x16xf32>, vector<2x8x16xf32> -> vector<2x8x32xf32>
    %243 = vector.shape_cast %242 : vector<2x8x32xf32> to vector<16x32xf32>
    %c1_102 = arith.constant 1 : index
    %c0_103 = arith.constant 0 : index
    %c0_104 = arith.constant 0 : index
    %244 = vector.load %arg8[%c1_102, %c0_103, %c0_104] : memref<2x32x32xf32, #tpu.memory_space<vmem>>, vector<1x32x32xf32>
    %245 = vector.shape_cast %244 : vector<1x32x32xf32> to vector<32x32xf32>
    %cst_105 = arith.constant dense<0.000000e+00> : vector<16x32xf32>
    %246 = tpu.matmul %243, %245, %cst_105 {dimension_numbers = #tpu.dot_dimension_numbers<[1], [0], [0], [1], [0, 0, 1, 1], [], []>} : vector<16x32xf32>, vector<32x32xf32>, vector<16x32xf32> -> vector<16x32xf32>
    %c1_106 = arith.constant 1 : index
    %c0_107 = arith.constant 0 : index
    %c0_108 = arith.constant 0 : index
    %247 = vector.load %arg9[%c1_106, %c0_107, %c0_108] : memref<2x1x32xf32, #tpu.memory_space<vmem>>, vector<1x1x32xf32>
    %248 = vector.shape_cast %247 : vector<1x1x32xf32> to vector<1x32xf32>
    %249 = vector.broadcast %248 : vector<1x32xf32> to vector<16x32xf32>
    %250 = arith.addf %246, %249 : vector<16x32xf32>
    %251 = arith.addf %192, %250 : vector<16x32xf32>
    %c1_109 = arith.constant 1 : index
    %c0_110 = arith.constant 0 : index
    %c0_111 = arith.constant 0 : index
    %252 = vector.load %arg10[%c1_109, %c0_110, %c0_111] : memref<2x1x32xf32, #tpu.memory_space<vmem>>, vector<1x1x32xf32>
    %253 = vector.shape_cast %252 : vector<1x1x32xf32> to vector<1x32xf32>
    %c1_112 = arith.constant 1 : index
    %c0_113 = arith.constant 0 : index
    %c0_114 = arith.constant 0 : index
    %254 = vector.load %arg11[%c1_112, %c0_113, %c0_114] : memref<2x1x32xf32, #tpu.memory_space<vmem>>, vector<1x1x32xf32>
    %255 = vector.shape_cast %254 : vector<1x1x32xf32> to vector<1x32xf32>
    %cst_115 = arith.constant dense<0.000000e+00> : vector<16xf32>
    %256 = vector.multi_reduction <add>, %251, %cst_115 [1] : vector<16x32xf32> to vector<16xf32>
    %257 = vector.shape_cast %256 : vector<16xf32> to vector<16x1xf32>
    %cst_116 = arith.constant 3.200000e+01 : f32
    %258 = vector.broadcast %cst_116 : f32 to vector<16x1xf32>
    %259 = arith.divf %257, %258 : vector<16x1xf32>
    %260 = vector.broadcast %259 : vector<16x1xf32> to vector<16x32xf32>
    %261 = arith.subf %251, %260 : vector<16x32xf32>
    %262 = arith.mulf %261, %261 : vector<16x32xf32>
    %cst_117 = arith.constant dense<0.000000e+00> : vector<16xf32>
    %263 = vector.multi_reduction <add>, %262, %cst_117 [1] : vector<16x32xf32> to vector<16xf32>
    %264 = vector.shape_cast %263 : vector<16xf32> to vector<16x1xf32>
    %cst_118 = arith.constant 3.200000e+01 : f32
    %265 = vector.broadcast %cst_118 : f32 to vector<16x1xf32>
    %266 = arith.divf %264, %265 : vector<16x1xf32>
    %267 = vector.broadcast %259 : vector<16x1xf32> to vector<16x32xf32>
    %268 = arith.subf %251, %267 : vector<16x32xf32>
    %cst_119 = arith.constant 9.99999996E-13 : f32
    %269 = vector.broadcast %cst_119 : f32 to vector<16x1xf32>
    %270 = arith.addf %266, %269 : vector<16x1xf32>
    %271 = math.rsqrt %270 : vector<16x1xf32>
    %272 = vector.broadcast %271 : vector<16x1xf32> to vector<16x32xf32>
    %273 = arith.mulf %268, %272 : vector<16x32xf32>
    %274 = vector.broadcast %253 : vector<1x32xf32> to vector<16x32xf32>
    %275 = arith.mulf %273, %274 : vector<16x32xf32>
    %276 = vector.broadcast %255 : vector<1x32xf32> to vector<16x32xf32>
    %277 = arith.addf %275, %276 : vector<16x32xf32>
    %c1_120 = arith.constant 1 : index
    %c0_121 = arith.constant 0 : index
    %c0_122 = arith.constant 0 : index
    %278 = vector.load %arg12[%c1_120, %c0_121, %c0_122] : memref<2x32x64xf32, #tpu.memory_space<vmem>>, vector<1x32x64xf32>
    %279 = vector.shape_cast %278 : vector<1x32x64xf32> to vector<32x64xf32>
    %cst_123 = arith.constant dense<0.000000e+00> : vector<16x64xf32>
    %280 = tpu.matmul %277, %279, %cst_123 {dimension_numbers = #tpu.dot_dimension_numbers<[1], [0], [0], [1], [0, 0, 1, 1], [], []>} : vector<16x32xf32>, vector<32x64xf32>, vector<16x64xf32> -> vector<16x64xf32>
    %c1_124 = arith.constant 1 : index
    %c0_125 = arith.constant 0 : index
    %c0_126 = arith.constant 0 : index
    %281 = vector.load %arg13[%c1_124, %c0_125, %c0_126] : memref<2x1x64xf32, #tpu.memory_space<vmem>>, vector<1x1x64xf32>
    %282 = vector.shape_cast %281 : vector<1x1x64xf32> to vector<1x64xf32>
    %283 = vector.broadcast %282 : vector<1x64xf32> to vector<16x64xf32>
    %284 = arith.addf %280, %283 : vector<16x64xf32>
    %cst_127 = arith.constant 5.000000e-01 : f32
    %285 = vector.broadcast %cst_127 : f32 to vector<16x64xf32>
    %286 = arith.mulf %285, %284 : vector<16x64xf32>
    %cst_128 = arith.constant 0.707106769 : f32
    %287 = vector.broadcast %cst_128 : f32 to vector<16x64xf32>
    %288 = arith.mulf %284, %287 : vector<16x64xf32>
    %cst_129 = arith.constant 0.000000e+00 : f32
    %289 = vector.broadcast %cst_129 : f32 to vector<16x64xf32>
    %290 = arith.cmpf oge, %288, %289 : vector<16x64xf32>
    %cst_130 = arith.constant 1.000000e+00 : f32
    %cst_131 = arith.constant -1.000000e+00 : f32
    %291 = vector.broadcast %cst_130 : f32 to vector<16x64xf32>
    %292 = vector.broadcast %cst_131 : f32 to vector<16x64xf32>
    %293 = arith.select %290, %291, %292 : vector<16x64xi1>, vector<16x64xf32>
    %294 = math.absf %288 : vector<16x64xf32>
    %cst_132 = arith.constant 0.327591091 : f32
    %295 = vector.broadcast %cst_132 : f32 to vector<16x64xf32>
    %296 = arith.mulf %295, %294 : vector<16x64xf32>
    %cst_133 = arith.constant 1.000000e+00 : f32
    %297 = vector.broadcast %cst_133 : f32 to vector<16x64xf32>
    %298 = arith.addf %297, %296 : vector<16x64xf32>
    %cst_134 = arith.constant 1.000000e+00 : f32
    %299 = vector.broadcast %cst_134 : f32 to vector<16x64xf32>
    %300 = arith.divf %299, %298 : vector<16x64xf32>
    %cst_135 = arith.constant 1.06140542 : f32
    %301 = vector.broadcast %cst_135 : f32 to vector<16x64xf32>
    %302 = arith.mulf %301, %300 : vector<16x64xf32>
    %cst_136 = arith.constant -1.45315206 : f32
    %303 = vector.broadcast %cst_136 : f32 to vector<16x64xf32>
    %304 = arith.addf %302, %303 : vector<16x64xf32>
    %305 = arith.mulf %304, %300 : vector<16x64xf32>
    %cst_137 = arith.constant 1.42141378 : f32
    %306 = vector.broadcast %cst_137 : f32 to vector<16x64xf32>
    %307 = arith.addf %305, %306 : vector<16x64xf32>
    %308 = arith.mulf %307, %300 : vector<16x64xf32>
    %cst_138 = arith.constant -0.284496725 : f32
    %309 = vector.broadcast %cst_138 : f32 to vector<16x64xf32>
    %310 = arith.addf %308, %309 : vector<16x64xf32>
    %311 = arith.mulf %310, %300 : vector<16x64xf32>
    %cst_139 = arith.constant 0.254829586 : f32
    %312 = vector.broadcast %cst_139 : f32 to vector<16x64xf32>
    %313 = arith.addf %311, %312 : vector<16x64xf32>
    %314 = arith.mulf %313, %300 : vector<16x64xf32>
    %cst_140 = arith.constant 0.000000e+00 : f32
    %315 = vector.broadcast %cst_140 : f32 to vector<16x64xf32>
    %316 = arith.subf %315, %294 : vector<16x64xf32>
    %317 = arith.mulf %316, %294 : vector<16x64xf32>
    %318 = math.exp %317 : vector<16x64xf32>
    %319 = arith.mulf %314, %318 : vector<16x64xf32>
    %cst_141 = arith.constant 1.000000e+00 : f32
    %320 = vector.broadcast %cst_141 : f32 to vector<16x64xf32>
    %321 = arith.subf %320, %319 : vector<16x64xf32>
    %322 = arith.mulf %293, %321 : vector<16x64xf32>
    %cst_142 = arith.constant 1.000000e+00 : f32
    %323 = vector.broadcast %cst_142 : f32 to vector<16x64xf32>
    %324 = arith.addf %323, %322 : vector<16x64xf32>
    %325 = arith.mulf %286, %324 : vector<16x64xf32>
    %c1_143 = arith.constant 1 : index
    %c0_144 = arith.constant 0 : index
    %c0_145 = arith.constant 0 : index
    %326 = vector.load %arg14[%c1_143, %c0_144, %c0_145] : memref<2x64x32xf32, #tpu.memory_space<vmem>>, vector<1x64x32xf32>
    %327 = vector.shape_cast %326 : vector<1x64x32xf32> to vector<64x32xf32>
    %cst_146 = arith.constant dense<0.000000e+00> : vector<16x32xf32>
    %328 = tpu.matmul %325, %327, %cst_146 {dimension_numbers = #tpu.dot_dimension_numbers<[1], [0], [0], [1], [0, 0, 1, 1], [], []>} : vector<16x64xf32>, vector<64x32xf32>, vector<16x32xf32> -> vector<16x32xf32>
    %c1_147 = arith.constant 1 : index
    %c0_148 = arith.constant 0 : index
    %c0_149 = arith.constant 0 : index
    %329 = vector.load %arg15[%c1_147, %c0_148, %c0_149] : memref<2x1x32xf32, #tpu.memory_space<vmem>>, vector<1x1x32xf32>
    %330 = vector.shape_cast %329 : vector<1x1x32xf32> to vector<1x32xf32>
    %331 = vector.broadcast %330 : vector<1x32xf32> to vector<16x32xf32>
    %332 = arith.addf %328, %331 : vector<16x32xf32>
    %333 = arith.addf %277, %332 : vector<16x32xf32>
    %c1_150 = arith.constant 1 : index
    %c0_151 = arith.constant 0 : index
    %c0_152 = arith.constant 0 : index
    %334 = vector.load %arg16[%c1_150, %c0_151, %c0_152] : memref<2x1x32xf32, #tpu.memory_space<vmem>>, vector<1x1x32xf32>
    %335 = vector.shape_cast %334 : vector<1x1x32xf32> to vector<1x32xf32>
    %c1_153 = arith.constant 1 : index
    %c0_154 = arith.constant 0 : index
    %c0_155 = arith.constant 0 : index
    %336 = vector.load %arg17[%c1_153, %c0_154, %c0_155] : memref<2x1x32xf32, #tpu.memory_space<vmem>>, vector<1x1x32xf32>
    %337 = vector.shape_cast %336 : vector<1x1x32xf32> to vector<1x32xf32>
    %cst_156 = arith.constant dense<0.000000e+00> : vector<16xf32>
    %338 = vector.multi_reduction <add>, %333, %cst_156 [1] : vector<16x32xf32> to vector<16xf32>
    %339 = vector.shape_cast %338 : vector<16xf32> to vector<16x1xf32>
    %cst_157 = arith.constant 3.200000e+01 : f32
    %340 = vector.broadcast %cst_157 : f32 to vector<16x1xf32>
    %341 = arith.divf %339, %340 : vector<16x1xf32>
    %342 = vector.broadcast %341 : vector<16x1xf32> to vector<16x32xf32>
    %343 = arith.subf %333, %342 : vector<16x32xf32>
    %344 = arith.mulf %343, %343 : vector<16x32xf32>
    %cst_158 = arith.constant dense<0.000000e+00> : vector<16xf32>
    %345 = vector.multi_reduction <add>, %344, %cst_158 [1] : vector<16x32xf32> to vector<16xf32>
    %346 = vector.shape_cast %345 : vector<16xf32> to vector<16x1xf32>
    %cst_159 = arith.constant 3.200000e+01 : f32
    %347 = vector.broadcast %cst_159 : f32 to vector<16x1xf32>
    %348 = arith.divf %346, %347 : vector<16x1xf32>
    %349 = vector.broadcast %341 : vector<16x1xf32> to vector<16x32xf32>
    %350 = arith.subf %333, %349 : vector<16x32xf32>
    %cst_160 = arith.constant 9.99999996E-13 : f32
    %351 = vector.broadcast %cst_160 : f32 to vector<16x1xf32>
    %352 = arith.addf %348, %351 : vector<16x1xf32>
    %353 = math.rsqrt %352 : vector<16x1xf32>
    %354 = vector.broadcast %353 : vector<16x1xf32> to vector<16x32xf32>
    %355 = arith.mulf %350, %354 : vector<16x32xf32>
    %356 = vector.broadcast %335 : vector<1x32xf32> to vector<16x32xf32>
    %357 = arith.mulf %355, %356 : vector<16x32xf32>
    %358 = vector.broadcast %337 : vector<1x32xf32> to vector<16x32xf32>
    %359 = arith.addf %357, %358 : vector<16x32xf32>
    %c0_161 = arith.constant 0 : index
    %c0_162 = arith.constant 0 : index
    %360 = vector.load %arg19[%c0_161, %c0_162] : memref<16x32xf32, #tpu.memory_space<vmem>>, vector<16x32xf32>
    tpu.vector_store %arg19[%c0_161, %c0_162], %359 {strides = array<i32>} : memref<16x32xf32, #tpu.memory_space<vmem>>, vector<16x32xf32>,
    %c0_163 = arith.constant 0 : index
    %361 = memref.load %arg1[%c0_163] : memref<8xi32, #tpu.memory_space<smem>>
    %c0_i32 = arith.constant 0 : i32
    %362 = arith.addi %c0_i32, %361 : i32
    %363 = arith.index_cast %362 : i32 to index
    %c0_164 = arith.constant 0 : index
    %364 = vector.load %arg19[%363, %c0_164] : memref<16x32xf32, #tpu.memory_space<vmem>>, vector<1x32xf32>
    %c0_165 = arith.constant 0 : index
    %c0_166 = arith.constant 0 : index
    %365 = vector.load %arg20[%c0_165, %c0_166] : memref<2x32xf32, #tpu.memory_space<vmem>>, vector<1x32xf32>
    tpu.vector_store %arg20[%c0_165, %c0_166], %364 {strides = array<i32>} : memref<2x32xf32, #tpu.memory_space<vmem>>, vector<1x32xf32>,
    %c1_167 = arith.constant 1 : index
    %366 = memref.load %arg1[%c1_167] : memref<8xi32, #tpu.memory_space<smem>>
    %c0_i32_168 = arith.constant 0 : i32
    %367 = arith.addi %c0_i32_168, %366 : i32
    %368 = arith.index_cast %367 : i32 to index
    %c0_169 = arith.constant 0 : index
    %369 = vector.load %arg19[%368, %c0_169] : memref<16x32xf32, #tpu.memory_space<vmem>>, vector<1x32xf32>
    %370 = vector.shape_cast %369 : vector<1x32xf32> to vector<1x1x32xf32>
    %c0_170 = arith.constant 0 : index
    %c0_171 = arith.constant 0 : index
    %c0_172 = arith.constant 0 : index
    %371 = vector.load %arg21[%c0_170, %c0_171, %c0_172] : memref<2x3x32xf32, #tpu.memory_space<vmem>>, vector<1x1x32xf32>
    tpu.vector_store %arg21[%c0_170, %c0_171, %c0_172], %370 {strides = array<i32>} : memref<2x3x32xf32, #tpu.memory_space<vmem>>, vector<1x1x32xf32>,
    %c2 = arith.constant 2 : index
    %372 = memref.load %arg1[%c2] : memref<8xi32, #tpu.memory_space<smem>>
    %c0_i32_173 = arith.constant 0 : i32
    %373 = arith.addi %c0_i32_173, %372 : i32
    %374 = arith.index_cast %373 : i32 to index
    %c0_174 = arith.constant 0 : index
    %375 = vector.load %arg19[%374, %c0_174] : memref<16x32xf32, #tpu.memory_space<vmem>>, vector<1x32xf32>
    %376 = vector.shape_cast %375 : vector<1x32xf32> to vector<1x1x32xf32>
    %c0_175 = arith.constant 0 : index
    %c1_176 = arith.constant 1 : index
    %c0_177 = arith.constant 0 : index
    %377 = vector.load %arg21[%c0_175, %c1_176, %c0_177] : memref<2x3x32xf32, #tpu.memory_space<vmem>>, vector<1x1x32xf32>
    tpu.vector_store %arg21[%c0_175, %c1_176, %c0_177], %376 {strides = array<i32>} : memref<2x3x32xf32, #tpu.memory_space<vmem>>, vector<1x1x32xf32>,
    %c3 = arith.constant 3 : index
    %378 = memref.load %arg1[%c3] : memref<8xi32, #tpu.memory_space<smem>>
    %c0_i32_178 = arith.constant 0 : i32
    %379 = arith.addi %c0_i32_178, %378 : i32
    %380 = arith.index_cast %379 : i32 to index
    %c0_179 = arith.constant 0 : index
    %381 = vector.load %arg19[%380, %c0_179] : memref<16x32xf32, #tpu.memory_space<vmem>>, vector<1x32xf32>
    %382 = vector.shape_cast %381 : vector<1x32xf32> to vector<1x1x32xf32>
    %c0_180 = arith.constant 0 : index
    %c2_181 = arith.constant 2 : index
    %c0_182 = arith.constant 0 : index
    %383 = vector.load %arg21[%c0_180, %c2_181, %c0_182] : memref<2x3x32xf32, #tpu.memory_space<vmem>>, vector<1x1x32xf32>
    tpu.vector_store %arg21[%c0_180, %c2_181, %c0_182], %382 {strides = array<i32>} : memref<2x3x32xf32, #tpu.memory_space<vmem>>, vector<1x1x32xf32>,
    %c4 = arith.constant 4 : index
    %384 = memref.load %arg1[%c4] : memref<8xi32, #tpu.memory_space<smem>>
    %c8_i32 = arith.constant 8 : i32
    %385 = arith.addi %c8_i32, %384 : i32
    %386 = arith.index_cast %385 : i32 to index
    %c0_183 = arith.constant 0 : index
    %387 = vector.load %arg19[%386, %c0_183] : memref<16x32xf32, #tpu.memory_space<vmem>>, vector<1x32xf32>
    %c1_184 = arith.constant 1 : index
    %c0_185 = arith.constant 0 : index
    %388 = vector.load %arg20[%c1_184, %c0_185] : memref<2x32xf32, #tpu.memory_space<vmem>>, vector<1x32xf32>
    tpu.vector_store %arg20[%c1_184, %c0_185], %387 {strides = array<i32>} : memref<2x32xf32, #tpu.memory_space<vmem>>, vector<1x32xf32>,
    %c5 = arith.constant 5 : index
    %389 = memref.load %arg1[%c5] : memref<8xi32, #tpu.memory_space<smem>>
    %c8_i32_186 = arith.constant 8 : i32
    %390 = arith.addi %c8_i32_186, %389 : i32
    %391 = arith.index_cast %390 : i32 to index
    %c0_187 = arith.constant 0 : index
    %392 = vector.load %arg19[%391, %c0_187] : memref<16x32xf32, #tpu.memory_space<vmem>>, vector<1x32xf32>
    %393 = vector.shape_cast %392 : vector<1x32xf32> to vector<1x1x32xf32>
    %c1_188 = arith.constant 1 : index
    %c0_189 = arith.constant 0 : index
    %c0_190 = arith.constant 0 : index
    %394 = vector.load %arg21[%c1_188, %c0_189, %c0_190] : memref<2x3x32xf32, #tpu.memory_space<vmem>>, vector<1x1x32xf32>
    tpu.vector_store %arg21[%c1_188, %c0_189, %c0_190], %393 {strides = array<i32>} : memref<2x3x32xf32, #tpu.memory_space<vmem>>, vector<1x1x32xf32>,
    %c6 = arith.constant 6 : index
    %395 = memref.load %arg1[%c6] : memref<8xi32, #tpu.memory_space<smem>>
    %c8_i32_191 = arith.constant 8 : i32
    %396 = arith.addi %c8_i32_191, %395 : i32
    %397 = arith.index_cast %396 : i32 to index
    %c0_192 = arith.constant 0 : index
    %398 = vector.load %arg19[%397, %c0_192] : memref<16x32xf32, #tpu.memory_space<vmem>>, vector<1x32xf32>
    %399 = vector.shape_cast %398 : vector<1x32xf32> to vector<1x1x32xf32>
    %c1_193 = arith.constant 1 : index
    %c1_194 = arith.constant 1 : index
    %c0_195 = arith.constant 0 : index
    %400 = vector.load %arg21[%c1_193, %c1_194, %c0_195] : memref<2x3x32xf32, #tpu.memory_space<vmem>>, vector<1x1x32xf32>
    tpu.vector_store %arg21[%c1_193, %c1_194, %c0_195], %399 {strides = array<i32>} : memref<2x3x32xf32, #tpu.memory_space<vmem>>, vector<1x1x32xf32>,
    %c7 = arith.constant 7 : index
    %401 = memref.load %arg1[%c7] : memref<8xi32, #tpu.memory_space<smem>>
    %c8_i32_196 = arith.constant 8 : i32
    %402 = arith.addi %c8_i32_196, %401 : i32
    %403 = arith.index_cast %402 : i32 to index
    %c0_197 = arith.constant 0 : index
    %404 = vector.load %arg19[%403, %c0_197] : memref<16x32xf32, #tpu.memory_space<vmem>>, vector<1x32xf32>
    %405 = vector.shape_cast %404 : vector<1x32xf32> to vector<1x1x32xf32>
    %c1_198 = arith.constant 1 : index
    %c2_199 = arith.constant 2 : index
    %c0_200 = arith.constant 0 : index
    %406 = vector.load %arg21[%c1_198, %c2_199, %c0_200] : memref<2x3x32xf32, #tpu.memory_space<vmem>>, vector<1x1x32xf32>
    tpu.vector_store %arg21[%c1_198, %c2_199, %c0_200], %405 {strides = array<i32>} : memref<2x3x32xf32, #tpu.memory_space<vmem>>, vector<1x1x32xf32>,
    %c0_201 = arith.constant 0 : index
    %c0_202 = arith.constant 0 : index
    %407 = vector.load %arg20[%c0_201, %c0_202] : memref<2x32xf32, #tpu.memory_space<vmem>>, vector<2x32xf32>
    %c0_203 = arith.constant 0 : index
    %c0_204 = arith.constant 0 : index
    %c0_205 = arith.constant 0 : index
    %408 = vector.load %arg21[%c0_203, %c0_204, %c0_205] : memref<2x3x32xf32, #tpu.memory_space<vmem>>, vector<2x3x32xf32>
    %409 = vector.shape_cast %407 : vector<2x32xf32> to vector<2x1x32xf32>
    %410 = vector.broadcast %409 : vector<2x1x32xf32> to vector<2x3x32xf32>
    %411 = arith.mulf %410, %408 : vector<2x3x32xf32>
    %cst_206 = arith.constant dense<0.000000e+00> : vector<2x3xf32>
    %412 = vector.multi_reduction <add>, %411, %cst_206 [2] : vector<2x3x32xf32> to vector<2x3xf32>
    %413 = arith.mulf %407, %407 : vector<2x32xf32>
    %cst_207 = arith.constant dense<0.000000e+00> : vector<2xf32>
    %414 = vector.multi_reduction <add>, %413, %cst_207 [1] : vector<2x32xf32> to vector<2xf32>
    %415 = vector.shape_cast %414 : vector<2xf32> to vector<2x1xf32>
    %416 = arith.mulf %408, %408 : vector<2x3x32xf32>
    %cst_208 = arith.constant dense<0.000000e+00> : vector<2x3xf32>
    %417 = vector.multi_reduction <add>, %416, %cst_208 [2] : vector<2x3x32xf32> to vector<2x3xf32>
    %418 = vector.broadcast %415 : vector<2x1xf32> to vector<2x3xf32>
    %419 = arith.mulf %418, %417 : vector<2x3xf32>
    %cst_209 = arith.constant 1.000000e-16 : f32
    %420 = vector.broadcast %cst_209 : f32 to vector<2x3xf32>
    %421 = arith.maximumf %419, %420 : vector<2x3xf32>
    %422 = math.sqrt %421 : vector<2x3xf32>
    %423 = arith.divf %412, %422 : vector<2x3xf32>
    %c0_210 = arith.constant 0 : index
    %c0_211 = arith.constant 0 : index
    %424 = vector.load %arg18[%c0_210, %c0_211] : memref<2x3xf32, #tpu.memory_space<vmem>>, vector<2x3xf32>
    tpu.vector_store %arg18[%c0_210, %c0_211], %423 {strides = array<i32>} : memref<2x3xf32, #tpu.memory_space<vmem>>, vector<2x3xf32>,
    return
  }
  func.func @transform_0(%arg0: i32, %arg1: memref<8xi32, #tpu.memory_space<smem>>) -> (i32, i32) {
    %c0_i32 = arith.constant 0 : i32
    %c0_i32_0 = arith.constant 0 : i32
    %c0_i32_1 = arith.constant 0 : i32
    return %c0_i32, %c0_i32_0 : i32, i32
  }
  func.func @transform_1(%arg0: i32, %arg1: memref<8xi32, #tpu.memory_space<smem>>) -> (i32, i32, i32) {
    %c0_i32 = arith.constant 0 : i32
    %c0_i32_0 = arith.constant 0 : i32
    %c0_i32_1 = arith.constant 0 : i32
    %c0_i32_2 = arith.constant 0 : i32
    return %c0_i32, %c0_i32_0, %c0_i32_1 : i32, i32, i32
  }
  func.func @transform_2(%arg0: i32, %arg1: memref<8xi32, #tpu.memory_space<smem>>) -> (i32, i32) {
    %c0_i32 = arith.constant 0 : i32
    %c0_i32_0 = arith.constant 0 : i32
    %c0_i32_1 = arith.constant 0 : i32
    return %c0_i32, %c0_i32_0 : i32, i32
  }
  func.func @transform_3(%arg0: i32, %arg1: memref<8xi32, #tpu.memory_space<smem>>) -> (i32, i32) {
    %c0_i32 = arith.constant 0 : i32
    %c0_i32_0 = arith.constant 0 : i32
    %c0_i32_1 = arith.constant 0 : i32
    return %c0_i32, %c0_i32_0 : i32, i32
  }
  func.func @transform_4(%arg0: i32, %arg1: memref<8xi32, #tpu.memory_space<smem>>) -> (i32, i32, i32) {
    %c0_i32 = arith.constant 0 : i32
    %c0_i32_0 = arith.constant 0 : i32
    %c0_i32_1 = arith.constant 0 : i32
    %c0_i32_2 = arith.constant 0 : i32
    return %c0_i32, %c0_i32_0, %c0_i32_1 : i32, i32, i32
  }
  func.func @transform_5(%arg0: i32, %arg1: memref<8xi32, #tpu.memory_space<smem>>) -> (i32, i32, i32) {
    %c0_i32 = arith.constant 0 : i32
    %c0_i32_0 = arith.constant 0 : i32
    %c0_i32_1 = arith.constant 0 : i32
    %c0_i32_2 = arith.constant 0 : i32
    return %c0_i32, %c0_i32_0, %c0_i32_1 : i32, i32, i32
  }
  func.func @transform_6(%arg0: i32, %arg1: memref<8xi32, #tpu.memory_space<smem>>) -> (i32, i32, i32) {
    %c0_i32 = arith.constant 0 : i32
    %c0_i32_0 = arith.constant 0 : i32
    %c0_i32_1 = arith.constant 0 : i32
    %c0_i32_2 = arith.constant 0 : i32
    return %c0_i32, %c0_i32_0, %c0_i32_1 : i32, i32, i32
  }
  func.func @transform_7(%arg0: i32, %arg1: memref<8xi32, #tpu.memory_space<smem>>) -> (i32, i32, i32) {
    %c0_i32 = arith.constant 0 : i32
    %c0_i32_0 = arith.constant 0 : i32
    %c0_i32_1 = arith.constant 0 : i32
    %c0_i32_2 = arith.constant 0 : i32
    return %c0_i32, %c0_i32_0, %c0_i32_1 : i32, i32, i32
  }
  func.func @transform_8(%arg0: i32, %arg1: memref<8xi32, #tpu.memory_space<smem>>) -> (i32, i32, i32) {
    %c0_i32 = arith.constant 0 : i32
    %c0_i32_0 = arith.constant 0 : i32
    %c0_i32_1 = arith.constant 0 : i32
    %c0_i32_2 = arith.constant 0 : i32
    return %c0_i32, %c0_i32_0, %c0_i32_1 : i32, i32, i32
  }
  func.func @transform_9(%arg0: i32, %arg1: memref<8xi32, #tpu.memory_space<smem>>) -> (i32, i32, i32) {
    %c0_i32 = arith.constant 0 : i32
    %c0_i32_0 = arith.constant 0 : i32
    %c0_i32_1 = arith.constant 0 : i32
    %c0_i32_2 = arith.constant 0 : i32
    return %c0_i32, %c0_i32_0, %c0_i32_1 : i32, i32, i32
  }
  func.func @transform_10(%arg0: i32, %arg1: memref<8xi32, #tpu.memory_space<smem>>) -> (i32, i32, i32) {
    %c0_i32 = arith.constant 0 : i32
    %c0_i32_0 = arith.constant 0 : i32
    %c0_i32_1 = arith.constant 0 : i32
    %c0_i32_2 = arith.constant 0 : i32
    return %c0_i32, %c0_i32_0, %c0_i32_1 : i32, i32, i32
  }
  func.func @transform_11(%arg0: i32, %arg1: memref<8xi32, #tpu.memory_space<smem>>) -> (i32, i32, i32) {
    %c0_i32 = arith.constant 0 : i32
    %c0_i32_0 = arith.constant 0 : i32
    %c0_i32_1 = arith.constant 0 : i32
    %c0_i32_2 = arith.constant 0 : i32
    return %c0_i32, %c0_i32_0, %c0_i32_1 : i32, i32, i32
  }
  func.func @transform_12(%arg0: i32, %arg1: memref<8xi32, #tpu.memory_space<smem>>) -> (i32, i32, i32) {
    %c0_i32 = arith.constant 0 : i32
    %c0_i32_0 = arith.constant 0 : i32
    %c0_i32_1 = arith.constant 0 : i32
    %c0_i32_2 = arith.constant 0 : i32
    return %c0_i32, %c0_i32_0, %c0_i32_1 : i32, i32, i32
  }
  func.func @transform_13(%arg0: i32, %arg1: memref<8xi32, #tpu.memory_space<smem>>) -> (i32, i32, i32) {
    %c0_i32 = arith.constant 0 : i32
    %c0_i32_0 = arith.constant 0 : i32
    %c0_i32_1 = arith.constant 0 : i32
    %c0_i32_2 = arith.constant 0 : i32
    return %c0_i32, %c0_i32_0, %c0_i32_1 : i32, i32, i32
  }
  func.func @transform_14(%arg0: i32, %arg1: memref<8xi32, #tpu.memory_space<smem>>) -> (i32, i32, i32) {
    %c0_i32 = arith.constant 0 : i32
    %c0_i32_0 = arith.constant 0 : i32
    %c0_i32_1 = arith.constant 0 : i32
    %c0_i32_2 = arith.constant 0 : i32
    return %c0_i32, %c0_i32_0, %c0_i32_1 : i32, i32, i32
  }
  func.func @transform_15(%arg0: i32, %arg1: memref<8xi32, #tpu.memory_space<smem>>) -> (i32, i32, i32) {
    %c0_i32 = arith.constant 0 : i32
    %c0_i32_0 = arith.constant 0 : i32
    %c0_i32_1 = arith.constant 0 : i32
    %c0_i32_2 = arith.constant 0 : i32
    return %c0_i32, %c0_i32_0, %c0_i32_1 : i32, i32, i32
  }
  func.func @transform_16(%arg0: i32, %arg1: memref<8xi32, #tpu.memory_space<smem>>) -> (i32, i32) {
    %c0_i32 = arith.constant 0 : i32
    %c0_i32_0 = arith.constant 0 : i32
    %c0_i32_1 = arith.constant 0 : i32
    return %c0_i32, %c0_i32_0 : i32, i32
  }
}

</mosaic_0001>

<bundles_post_ra>
// kernel: model_forward.1
= control target key start
LH: loop header
LB: loop body
LE: loop exit
PB: predicated region body
PF: predicated region fallthrough
CT: control target
= control target key end

     0   :  { %s3754_s0 = inlined_call_operand.vmem [shape: s32[8], index: 0, kind: input, shape index: {}]   ;;  %s3755_s1 = inlined_call_operand.vmem [shape: f32[16,32], index: 1, kind: input, shape index: {}]   ;;  %s3756_s2 = inlined_call_operand.vmem [shape: f32[2,1,8], index: 2, kind: input, shape index: {}]   ;;  %s3757_s3 = inlined_call_operand.vmem [shape: f32[1,32], index: 3, kind: input, shape index: {}]   ;;  %s3758_s4 = inlined_call_operand.vmem [shape: f32[1,32], index: 4, kind: input, shape index: {}]   ;;  %s3759_s5 = inlined_call_operand.vmem [shape: f32[2,32,96], index: 5, kind: input, shape index: {}]   ;;  %s3760_s6 = inlined_call_operand.vmem [shape: f32[2,1,96], index: 6, kind: input, shape index: {}]   ;;  %s3761_s7 = inlined_call_operand.vmem [shape: f32[2,32,32], index: 7, kind: input, shape index: {}]   ;;  %s3762_s8 = inlined_call_operand.vmem [shape: f32[2,1,32], index: 8, kind: input, shape index: {}]   ;;  %s3763_s9 = inlined_call_operand.vmem [shape: f32[2,1,32], index: 9, kind: input, shape index: {}]   ;;  %s3764_s10 = inlined_call_operand.vmem [shape: f32[2,1,32], index: 10, kind: input, shape index: {}]   ;;  %s3765_s11 = inlined_call_operand.vmem [shape: f32[2,32,64], index: 11, kind: input, shape index: {}]   ;;  %s3766_s12 = inlined_call_operand.vmem [shape: f32[2,1,64], index: 12, kind: input, shape index: {}]   ;;  %s3767_s13 = inlined_call_operand.vmem [shape: f32[2,64,32], index: 13, kind: input, shape index: {}]   ;;  %s3768_s14 = inlined_call_operand.vmem [shape: f32[2,1,32], index: 14, kind: input, shape index: {}]   ;;  %s3769_s15 = inlined_call_operand.vmem [shape: f32[2,1,32], index: 15, kind: input, shape index: {}]   ;;  %s3770_s16 = inlined_call_operand.vmem [shape: f32[2,1,32], index: 16, kind: input, shape index: {}]   ;;  %s3771_s17 = inlined_call_operand.hbm [shape: f32[2,3], index: 17, kind: output, shape index: {}]  }
   0x1   :  { %3774 = sst [smem:[#allocation11_spill]] %s3754_s0 }
   0x2   :  { %3775 = sst [smem:[#allocation12_spill]] %s3755_s1 }
   0x3   :  { %3776 = sst [smem:[#allocation13_spill]] %s3764_s10 }
   0x4   :  { %s3777_s26 = sld [smem:[#allocation11_spill]] }
   0xa   :  { %s22_s10 = sshll.u32 %s3777_s26, 4  ;;  %s23_s10 = int_to_ptr.vmem [resolvable:$true] %s22_s10 }
   0xb   :  { %s3167_s27 = scalar_lea.vmem %s23_s10, 16  ;;  %p3172_p1 = scmp.lt.s32.totalorder %s23_s10, %s23_s10 }
   0xc   :  { %p3168_p0 = scmp.ne.s32.totalorder %s23_s10, %s3167_s27  ;;  %p3173_p2 = scmp.lt.s32.totalorder %s3167_s27, %s3167_s27 }
   0xe   :  { %p3174_p3 = por %p3173_p2, %p3172_p1 }
  0x10   :  { %p3175_p4 = pnand %p3174_p3, %p3168_p0 }
  0x12   :  { %3178 = shalt.err (!%p3175_p4)  }
  0x13   :  { %s3203_s28 = smov [#allocation6]  }
  0x14   :  { %25 = dma.vmem_to_smem %s23_s10, 16, %s3203_s28, [#allocation5] }
  0x15   :  { %3199 = dma.done.wait [#allocation5], 16 }
  0x16   :  { %3200 = vsyncadd [#allocation5], 4294967280 }
  0x17   :  { %27 = sfence }
  0x18   :  { %s3778_s30 = sld [smem:[#allocation12_spill]]  ;;  %vm65_vm0 = vcmask 261120  }
  0x1e   :  { %v61_v0 = vld [vmem:[%s3778_s30] sm:$0xff]  ;;  %v62_v1 = vld [vmem:[%s3778_s30 + $0x8] sm:$0xff] }
  0x1f   :  { %28 = vsyncpa [#allocation8], 0  ;;  %v66_v2 = vsel %vm65_vm0, %v61_v0, 0.0  ;;  %v69_v3 = vsel %vm65_vm0, %v62_v1, 0.0  ;;  %v114_v14 = vld [vmem:[%s3759_s5 + $0x18] sm:$0xff]  ;;  %v113_v15 = vld [vmem:[%s3759_s5 + $0x10] sm:$0xff] }
  0x20   :  { %67 = vadd.xlane.f32.xlu0 %v66_v2  ;;  %2894 = vmatprep.subr.mxu1 %v114_v14  ;;  %v112_v16 = vld [vmem:[%s3759_s5 + $0x8] sm:$0xff]  ;;  %v111_v17 = vld [vmem:[%s3759_s5] sm:$0xff]  ;;  %v3204_v34 = vmov 0.0   ;;  %vm3205_vm1 = vmmov 0   ;;  %s3206_s0 = smov 96   ;;  %vm220_vm2 = vcmask 130048  }
  0x21   :  { %2895 = vmatpush3.msra.mxu1 %v114_v14  ;;  %v2707_v25 = vld [vmem:[%s3757_s3] ss:$0 sm:$0xff]  ;;  %2915 = vmatprep.subr.mxu0 %v3204_v34  ;;  %vm374_vm3 = vcmask 64512   ;;  %v3383_v48 = vld [vmem:[%s3756_s2 + $0x1] ss:$0 sm:$0xff]  ;;  %s3207_s1 = smov 64  }
  0x22   :  { %2896 = vmatprep.subr.mxu1 %v113_v15  ;;  %v2708_v27 = vld [vmem:[%s3758_s4] ss:$0 sm:$0xff]  ;;  %2917 = vmatprep.mubr.msk.f32.mxu0 %vm3205_vm1, %v3204_v34  ;;  %s3208_s20 = smov 80   ;;  %s3210_s21 = smov 48   ;;  %vm1188_vm6 = vcmask 523264   ;;  %vm2523_vm9 = vcmask 253952  }
  0x23   :  { %2897 = vmatpush3.msra.mxu1 %v113_v15  ;;  %v2709_v35 = vld [vmem:[%s3760_s6] ss:$0 sm:$0xff]  ;;  %s3211_s3 = smov 16   ;;  %s3779_s30 = sld [smem:[#allocation13_spill]]  ;;  %vm2596_vm10 = vcmask 256000   ;;  %vm2604_vm11 = vcmask 254976  }
  0x24   :  { %70 = vadd.xlane.f32.xlu0 %v69_v3  ;;  %2898 = vmatprep.subr.mxu1 %v112_v16  ;;  %v3377_v44 = vld [vmem:[%s3756_s2] ss:$0 sm:$0xff]  ;;  %s3209_s2 = smov 112   ;;  %s2800_s23 = sld [smem:[#allocation6 + $0x5]]  ;;  %vm2628_vm12 = vcmask 1041409   ;;  %vm2679_vm15 = vcmask 17408  }
  0x25   :  { %2899 = vmatpush3.msra.mxu1 %v112_v16  ;;  %s2802_s24 = sld [smem:[#allocation6 + $0x6]]  ;;  %s3215_s29 = smov [#allocation7]  }
  0x26   :  { %2900 = vmatprep.subr.mxu1 %v111_v17  ;;  %s2804_s26 = sld [smem:[#allocation6 + $0x7]] }
  0x27   :  { %2901 = vmatpush3.msra.mxu1 %v111_v17  ;;  %s2795_s27 = sld [smem:[#allocation6 + $0x1]] }
  0x28   :  { %2905 = vmatprep.subr.mxu1 %v3204_v34 }
  0xa9   :  { %v68_v4 = vpop.xlane.xlu0 %67 }
  0xaa   :  { %v73_v5 = vmul.f32 0.03125, %v68_v4 }
  0xac   :  { %v75_v6 = vsub.f32 %v61_v0, %v73_v5 }
  0xad   :  { %v71_v7 = vpop.xlane.xlu0 %70 }
  0xae   :  { %v74_v8 = vmul.f32 0.03125, %v71_v7  ;;  %v77_v9 = vmul.f32 %v75_v6, %v75_v6 }
  0xb0   :  { %v76_v10 = vsub.f32 %v62_v1, %v74_v8  ;;  %v79_v11 = vsel %vm65_vm0, %v77_v9, 0.0 }
  0xb1   :  { %80 = vadd.xlane.f32.xlu1 %v79_v11 }
  0xb2   :  { %v78_v12 = vmul.f32 %v76_v10, %v76_v10 }
  0xb4   :  { %v82_v13 = vsel %vm65_vm0, %v78_v12, 0.0 }
  0xb5   :  { %83 = vadd.xlane.f32.xlu1 %v82_v13 }
 0x13a   :  { %v81_v18 = vpop.xlane.xlu1 %80 }
 0x13b   :  { %v85_v19 = vmul.f32 0.03125, %v81_v18 }
 0x13d   :  { %v87_v20 = vadd.f32 1e-12, %v85_v19 }
 0x13e   :  { %v84_v21 = vpop.xlane.xlu1 %83 }
 0x13f   :  { %3093 = vrsqrt.f32 %v87_v20  ;;  %v86_v22 = vmul.f32 0.03125, %v84_v21 }
 0x141   :  { %v88_v23 = vadd.f32 1e-12, %v86_v22 }
 0x143   :  { %3095 = vrsqrt.f32 %v88_v23 }
 0x14c   :  { %v3094_v24 = vpop.eup %3093 }
 0x14d   :  { %v91_v26 = vmul.f32 %v3094_v24, %v75_v6 }
 0x14f   :  { %v99_v28 = vmul.f32 %v2707_v25, %v91_v26 }
 0x150   :  { %v3096_v29 = vpop.eup %3095 }
 0x151   :  { %v92_v30 = vmul.f32 %v3096_v29, %v76_v10  ;;  %v3337_v31 = vadd.f32 %v2708_v27, %v99_v28 }
 0x153   :  { %v100_v32 = vmul.f32 %v2707_v25, %v92_v30  ;;  %2902 = vmatprep.mubr.msk.f32.mxu1 %vm65_vm0, %v3337_v31 }
 0x155   :  { %v3341_v33 = vadd.f32 %v2708_v27, %v100_v32 }
 0x157   :  { %2903 = vmatmul.mubr.msk.f32.vlgmr.msra.gmra.mxu1 %vm65_vm0, %v3341_v33 }
 0x158   :  { %2907 = vmatprep.mubr.msk.f32.mxu1 %vm3205_vm1, %v3204_v34 }
 0x217   :  { %v2904_v36 = vpop.f32.mrf.mxu1 }
 0x218   :  { %v3354_v37 = vadd.f32 %v2904_v36, %v2709_v35 }
 0x219   :  { %v194_v38 = vpop.f32.mrf.mxu1 }
 0x21a   :  { %v3356_v39 = vadd.f32 %v2709_v35, %v194_v38  ;;  %297 = vrot.lane.b32.xlu1 %v3354_v37, %s3206_s0  ;;  %v204_v43 = vmul.f32 0.25, %v3354_v37 }
 0x21c   :  { %218 = vrot.lane.b32.xlu0 %v3356_v39, %s3206_s0  ;;  %v203_v41 = vmul.f32 0.25, %v3356_v39 }
 0x28c   :  { %v298_v42 = vpop.permute.xlu1 %297 }
 0x28e   :  { %v219_v40 = vpop.permute.xlu0 %218 }
 0x28f   :  { %2906 = vmatpush3.xpose.msk.msra.mxu1 %vm220_vm2, %v219_v40 }
 0x290   :  { %2910 = vmatprep.subr.mxu1 %v3204_v34 }
 0x292   :  { %2908 = vmatmul.mubr.msk.f32.vlgmr.msra.gmra.mxu1 %vm220_vm2, %v203_v41 }
 0x293   :  { %2911 = vmatpush3.xpose.msk.msra.mxu1 %vm220_vm2, %v298_v42  ;;  %2912 = vmatprep.mubr.msk.f32.mxu1 %vm3205_vm1, %v3204_v34 }
 0x294   :  { %2920 = vmatprep.subr.mxu1 %v3204_v34 }
 0x296   :  { %2913 = vmatmul.mubr.msk.f32.vlgmr.msra.gmra.mxu1 %vm220_vm2, %v204_v43 }
 0x297   :  { %2922 = vmatprep.mubr.msk.f32.mxu1 %vm3205_vm1, %v3204_v34 }
 0x352   :  { %v292_v45 = vpop.f32.mrf.mxu1 }
 0x353   :  { %v293_v46 = vadd.f32 %v3377_v44, %v292_v45 }
 0x354   :  { %v2909_v47 = vpop.f32.mrf.mxu1 }
 0x355   :  { %v375_v49 = vsel %vm374_vm3, %v293_v46, -inf  ;;  %v892_v47 = vld [vmem:[%s3761_s7 + $0x18] sm:$0xff] }
 0x356   :  { %376 = vmax.xlane.f32.xlu1 %v375_v49  ;;  %v370_v50 = vpop.f32.mrf.mxu1  ;;  %v890_v49 = vld [vmem:[%s3761_s7 + $0x8] sm:$0xff] }
 0x357   :  { %v371_v51 = vadd.f32 %v3383_v48, %v370_v50  ;;  %v889_v50 = vld [vmem:[%s3761_s7] sm:$0xff] }
 0x358   :  { %v2914_v52 = vpop.f32.mrf.mxu1 }
 0x359   :  { %v378_v53 = vsel %vm374_vm3, %v371_v51, -inf }
 0x35a   :  { %379 = vmax.xlane.f32.xlu0 %v378_v53 }
 0x367   :  { %473 = vrot.lane.b32.xlu1 %v3354_v37, %s3207_s1 }
 0x36b   :  { %551 = vrot.lane.b32.xlu1 %v3356_v39, %s3208_s20 }
 0x36f   :  { %629 = vrot.lane.b32.xlu1 %v3354_v37, %s3208_s20 }
 0x3df   :  { %v377_v54 = vpop.xlane.xlu1 %376 }
 0x3e0   :  { %v381_v55 = vsub.f32 %v293_v46, %v377_v54 }
 0x3e2   :  { %v383_v56 = vmul.f32 1.442695, %v381_v55 }
 0x3e3   :  { %v474_v57 = vpop.permute.xlu1 %473  ;;  %v380_v58 = vpop.xlane.xlu0 %379 }
 0x3e4   :  { %3097 = vpow2.f32 %v383_v56  ;;  %v382_v59 = vsub.f32 %v371_v51, %v380_v58  ;;  %2921 = vmatpush3.msra.mxu1 %v474_v57 }
 0x3e5   :  { %2930 = vmatprep.subr.mxu1 %v3204_v34 }
 0x3e6   :  { %v385_v60 = vmul.f32 1.442695, %v382_v59  ;;  %v2726_v59 = vld [vmem:[%s3762_s8] ss:$0 sm:$0xff] }
 0x3e7   :  { %v552_v1 = vpop.permute.xlu1 %551 }
 0x3e8   :  { %3099 = vpow2.f32 %v385_v60 }
 0x3eb   :  { %v630_v2 = vpop.permute.xlu1 %629 }
 0x3f1   :  { %v3098_v61 = vpop.eup %3097 }
 0x3f2   :  { %v387_v62 = vsel %vm374_vm3, %v3098_v61, 0.0 }
 0x3f3   :  { %388 = vadd.xlane.f32.xlu0 %v387_v62 }
 0x3f5   :  { %v3100_v63 = vpop.eup %3099 }
 0x3f6   :  { %v390_v0 = vsel %vm374_vm3, %v3100_v63, 0.0 }
 0x3f7   :  { %391 = vadd.xlane.f32.xlu1 %v390_v0 }
 0x408   :  { %627 = vrot.lane.b32.xlu1 %v204_v43, %s3209_s2 }
 0x409   :  { %397 = vrot.lane.b32.xlu0 %v3356_v39, %s3207_s1 }
 0x40d   :  { %549 = vrot.lane.b32.xlu0 %v203_v41, %s3209_s2 }
 0x47c   :  { %v389_v3 = vpop.xlane.xlu0 %388 }
 0x47d   :  { %3101 = vrcp.f32 %v389_v3 }
 0x480   :  { %v392_v4 = vpop.xlane.xlu1 %391  ;;  %v398_v5 = vpop.permute.xlu0 %397 }
 0x481   :  { %3103 = vrcp.f32 %v392_v4  ;;  %2916 = vmatpush3.msra.mxu0 %v398_v5 }
 0x482   :  { %2925 = vmatprep.subr.mxu0 %v3204_v34 }
 0x484   :  { %v550_v10 = vpop.permute.xlu0 %549  ;;  %v628_v11 = vpop.permute.xlu1 %627 }
 0x48a   :  { %v3102_v6 = vpop.eup %3101 }
 0x48b   :  { %v395_v7 = vmul.f32 %v3102_v6, %v3098_v61 }
 0x48d   :  { %2918 = vmatmul.mubr.msk.f32.vlgmr.msra.gmra.mxu0 %vm374_vm3, %v395_v7 }
 0x48e   :  { %v3104_v8 = vpop.eup %3103  ;;  %2926 = vmatpush3.xpose.msk.msra.mxu0 %vm220_vm2, %v552_v1  ;;  %2927 = vmatprep.mubr.msk.f32.mxu0 %vm3205_vm1, %v3204_v34 }
 0x48f   :  { %v396_v9 = vmul.f32 %v3104_v8, %v3100_v63  ;;  %2935 = vmatprep.subr.mxu0 %v3204_v34 }
 0x491   :  { %2923 = vmatmul.mubr.msk.f32.vlgmr.msra.gmra.mxu1 %vm374_vm3, %v396_v9  ;;  %2928 = vmatmul.mubr.msk.f32.vlgmr.msra.gmra.mxu0 %vm220_vm2, %v550_v10 }
 0x492   :  { %2931 = vmatpush3.xpose.msk.msra.mxu1 %vm220_vm2, %v630_v2  ;;  %2932 = vmatprep.mubr.msk.f32.mxu1 %vm3205_vm1, %v3204_v34 }
 0x493   :  { %2940 = vmatprep.subr.mxu1 %v3204_v34  ;;  %2937 = vmatprep.mubr.msk.f32.mxu0 %vm3205_vm1, %v3204_v34 }
 0x495   :  { %2933 = vmatmul.mubr.msk.f32.vlgmr.msra.gmra.mxu1 %vm220_vm2, %v628_v11 }
 0x496   :  { %2942 = vmatprep.mubr.msk.f32.mxu1 %vm3205_vm1, %v3204_v34 }
 0x54d   :  { %v3418_v12 = vpop.f32.mrf.mxu0 }
 0x54f   :  { %v2919_v13 = vpop.f32.mrf.mxu0 }
 0x550   :  { %v1029_v13 = vld [vmem:[%s3765_s11 + $0x10] sm:$0xff] }
 0x551   :  { %v3420_v14 = vpop.f32.mrf.mxu1  ;;  %v623_v15 = vpop.f32.mrf.mxu0 }
 0x552   :  { %v624_v16 = vadd.f32 %v3377_v44, %v623_v15  ;;  %v1027_v15 = vld [vmem:[%s3765_s11] sm:$0xff] }
 0x553   :  { %v2924_v17 = vpop.f32.mrf.mxu1  ;;  %v2929_v18 = vpop.f32.mrf.mxu0 }
 0x554   :  { %v705_v19 = vsel %vm374_vm3, %v624_v16, -inf }
 0x555   :  { %706 = vmax.xlane.f32.xlu0 %v705_v19  ;;  %v701_v20 = vpop.f32.mrf.mxu1 }
 0x556   :  { %v702_v21 = vadd.f32 %v3383_v48, %v701_v20 }
 0x557   :  { %v2934_v22 = vpop.f32.mrf.mxu1 }
 0x558   :  { %v708_v23 = vsel %vm374_vm3, %v702_v21, -inf }
 0x559   :  { %709 = vmax.xlane.f32.xlu1 %v708_v23  ;;  %v2729_v23 = vld [vmem:[%s3763_s9] ss:$0 sm:$0xff] }
 0x56a   :  { %803 = vrot.lane.b32.xlu1 %v3354_v37, %s3210_s21 }
 0x5de   :  { %v707_v24 = vpop.xlane.xlu0 %706 }
 0x5df   :  { %v711_v25 = vsub.f32 %v624_v16, %v707_v24 }
 0x5e1   :  { %v713_v26 = vmul.f32 1.442695, %v711_v25  ;;  %v2730_v25 = vld [vmem:[%s3779_s30] ss:$0 sm:$0xff] }
 0x5e2   :  { %v710_v27 = vpop.xlane.xlu1 %709 }
 0x5e3   :  { %3105 = vpow2.f32 %v713_v26  ;;  %v712_v28 = vsub.f32 %v702_v21, %v710_v27 }
 0x5e5   :  { %v715_v29 = vmul.f32 1.442695, %v712_v28 }
 0x5e6   :  { %v804_v30 = vpop.permute.xlu1 %803 }
 0x5e7   :  { %3107 = vpow2.f32 %v715_v29  ;;  %2941 = vmatpush3.msra.mxu1 %v804_v30 }
 0x5f0   :  { %v3106_v32 = vpop.eup %3105 }
 0x5f1   :  { %v717_v35 = vsel %vm374_vm3, %v3106_v32, 0.0 }
 0x5f2   :  { %718 = vadd.xlane.f32.xlu0 %v717_v35  ;;  %v1180_v35 = vld [vmem:[%s3767_s13 + $0x38] sm:$0xff] }
 0x5f4   :  { %v3108_v36 = vpop.eup %3107 }
 0x5f5   :  { %v720_v38 = vsel %vm374_vm3, %v3108_v36, 0.0 }
 0x5f6   :  { %721 = vadd.xlane.f32.xlu0 %v720_v38  ;;  %v1178_v38 = vld [vmem:[%s3767_s13 + $0x28] sm:$0xff] }
 0x60c   :  { %727 = vrot.lane.b32.xlu0 %v3356_v39, %s3210_s21  ;;  %v891_v39 = vld [vmem:[%s3761_s7 + $0x10] sm:$0xff] }
 0x67b   :  { %v719_v37 = vpop.xlane.xlu0 %718 }
 0x67c   :  { %3109 = vrcp.f32 %v719_v37  ;;  %v1177_v37 = vld [vmem:[%s3767_s13 + $0x20] sm:$0xff] }
 0x67f   :  { %v722_v40 = vpop.xlane.xlu0 %721 }
 0x680   :  { %3111 = vrcp.f32 %v722_v40  ;;  %v1176_v40 = vld [vmem:[%s3767_s13 + $0x18] sm:$0xff] }
 0x683   :  { %v728_v41 = vpop.permute.xlu0 %727 }
 0x684   :  { %2936 = vmatpush3.msra.mxu0 %v728_v41  ;;  %v1175_v41 = vld [vmem:[%s3767_s13 + $0x10] sm:$0xff] }
 0x685   :  { %2945 = vmatprep.subr.mxu0 %v892_v47 }
 0x689   :  { %v3110_v42 = vpop.eup %3109 }
 0x68a   :  { %v725_v43 = vmul.f32 %v3110_v42, %v3106_v32  ;;  %v1174_v42 = vld [vmem:[%s3767_s13 + $0x8] sm:$0xff] }
 0x68c   :  { %2938 = vmatmul.mubr.msk.f32.vlgmr.msra.gmra.mxu0 %vm374_vm3, %v725_v43  ;;  %v1173_v43 = vld [vmem:[%s3767_s13] sm:$0xff] }
 0x68d   :  { %v3112_v45 = vpop.eup %3111  ;;  %2946 = vmatpush3.msra.mxu0 %v892_v47 }
 0x68e   :  { %v726_v46 = vmul.f32 %v3112_v45, %v3108_v36  ;;  %2947 = vmatprep.subr.mxu0 %v891_v39  ;;  %v1179_v36 = vld [vmem:[%s3767_s13 + $0x30] sm:$0xff]  ;;  %v2731_v45 = vld [vmem:[%s3766_s12] ss:$0 sm:$0xff] }
 0x68f   :  { %2948 = vmatpush3.msra.mxu0 %v891_v39 }
 0x690   :  { %2943 = vmatmul.mubr.msk.f32.vlgmr.msra.gmra.mxu1 %vm374_vm3, %v726_v46  ;;  %2949 = vmatprep.subr.mxu0 %v890_v49 }
 0x691   :  { %2950 = vmatpush3.msra.mxu0 %v890_v49 }
 0x692   :  { %2951 = vmatprep.subr.mxu0 %v889_v50 }
 0x693   :  { %2952 = vmatpush3.msra.mxu0 %v889_v50 }
 0x694   :  { %2967 = vmatprep.subr.mxu0 %v1180_v35 }
 0x74c   :  { %v799_v51 = vpop.f32.mrf.mxu0 }
 0x74d   :  { %881 = vrot.lane.b32.xlu1 %v799_v51, %s3211_s3 }
 0x74e   :  { %v2939_v52 = vpop.f32.mrf.mxu0 }
 0x750   :  { %v875_v53 = vpop.f32.mrf.mxu1 }
 0x751   :  { %883 = vrot.lane.b32.xlu1 %v875_v53, %s3211_s3 }
 0x752   :  { %v2944_v54 = vpop.f32.mrf.mxu1 }
 0x7bf   :  { %v882_v55 = vpop.permute.xlu1 %881 }
 0x7c0   :  { %v887_v56 = vsel %vm220_vm2, %v3418_v12, %v882_v55 }
 0x7c1   :  { %2953 = vmatprep.mubr.msk.f32.mxu0 %vm65_vm0, %v887_v56 }
 0x7c3   :  { %v884_v57 = vpop.permute.xlu1 %883 }
 0x7c4   :  { %v888_v58 = vsel %vm220_vm2, %v3420_v14, %v884_v57  ;;  %v1028_v14 = vld [vmem:[%s3765_s11 + $0x8] sm:$0xff] }
 0x7c5   :  { %2954 = vmatmul.mubr.msk.f32.vlgmr.msra.gmra.mxu0 %vm65_vm0, %v888_v58 }
 0x7c6   :  { %2968 = vmatpush3.msra.mxu0 %v1180_v35 }
 0x7c7   :  { %2969 = vmatprep.subr.mxu0 %v1179_v36 }
 0x7c8   :  { %2970 = vmatpush3.msra.mxu0 %v1179_v36 }
 0x7c9   :  { %2971 = vmatprep.subr.mxu0 %v1178_v38 }
 0x7ca   :  { %2972 = vmatpush3.msra.mxu0 %v1178_v38 }
 0x7cb   :  { %2973 = vmatprep.subr.mxu0 %v1177_v37 }
 0x7cc   :  { %2974 = vmatpush3.msra.mxu0 %v1177_v37 }
 0x7cd   :  { %2975 = vmatprep.subr.mxu0 %v1176_v40 }
 0x7ce   :  { %2976 = vmatpush3.msra.mxu0 %v1176_v40 }
 0x7cf   :  { %2977 = vmatprep.subr.mxu0 %v1175_v41 }
 0x7d0   :  { %2978 = vmatpush3.msra.mxu0 %v1175_v41  ;;  %v2734_v41 = vld [vmem:[%s3768_s14] ss:$0 sm:$0xff] }
 0x7d1   :  { %2979 = vmatprep.subr.mxu0 %v1174_v42 }
 0x7d2   :  { %2980 = vmatpush3.msra.mxu0 %v1174_v42 }
 0x7d3   :  { %2981 = vmatprep.subr.mxu0 %v1173_v43 }
 0x7d4   :  { %2982 = vmatpush3.msra.mxu0 %v1173_v43 }
 0x7d5   :  { %3007 = vmatprep.subr.mxu0 %v3204_v34 }
 0x885   :  { %v2955_v60 = vpop.f32.mrf.mxu0 }
 0x886   :  { %v978_v61 = vadd.f32 %v2955_v60, %v2726_v59 }
 0x887   :  { %v972_v62 = vpop.f32.mrf.mxu0 }
 0x888   :  { %v973_v63 = vadd.f32 %v2726_v59, %v972_v62  ;;  %v982_v0 = vadd.f32 %v978_v61, %v3341_v33 }
 0x88a   :  { %v988_v1 = vsel %vm65_vm0, %v982_v0, 0.0  ;;  %v981_v2 = vadd.f32 %v973_v63, %v3337_v31  ;;  %v1030_v31 = vld [vmem:[%s3765_s11 + $0x18] sm:$0xff] }
 0x88b   :  { %989 = vadd.xlane.f32.xlu1 %v988_v1  ;;  %2956 = vmatprep.subr.mxu1 %v1030_v31 }
 0x88c   :  { %v985_v3 = vsel %vm65_vm0, %v981_v2, 0.0  ;;  %2957 = vmatpush3.msra.mxu1 %v1030_v31 }
 0x88d   :  { %986 = vadd.xlane.f32.xlu0 %v985_v3  ;;  %2958 = vmatprep.subr.mxu1 %v1029_v13 }
 0x88e   :  { %2959 = vmatpush3.msra.mxu1 %v1029_v13 }
 0x88f   :  { %2960 = vmatprep.subr.mxu1 %v1028_v14 }
 0x890   :  { %2961 = vmatpush3.msra.mxu1 %v1028_v14 }
 0x891   :  { %2962 = vmatprep.subr.mxu1 %v1027_v15 }
 0x892   :  { %2963 = vmatpush3.msra.mxu1 %v1027_v15 }
 0x914   :  { %v990_v4 = vpop.xlane.xlu1 %989 }
 0x915   :  { %v992_v5 = vmul.f32 0.03125, %v990_v4 }
 0x916   :  { %v987_v6 = vpop.xlane.xlu0 %986 }
 0x917   :  { %v991_v7 = vmul.f32 0.03125, %v987_v6  ;;  %v994_v8 = vsub.f32 %v982_v0, %v992_v5 }
 0x919   :  { %v993_v9 = vsub.f32 %v981_v2, %v991_v7  ;;  %v996_v12 = vmul.f32 %v994_v8, %v994_v8 }
 0x91b   :  { %v995_v10 = vmul.f32 %v993_v9, %v993_v9  ;;  %v1000_v33 = vsel %vm65_vm0, %v996_v12, 0.0 }
 0x91d   :  { %v997_v11 = vsel %vm65_vm0, %v995_v10, 0.0 }
 0x91e   :  { %998 = vadd.xlane.f32.xlu0 %v997_v11 }
 0x922   :  { %1001 = vadd.xlane.f32.xlu0 %v1000_v33 }
 0x9a7   :  { %v999_v16 = vpop.xlane.xlu0 %998 }
 0x9a8   :  { %v1003_v17 = vmul.f32 0.03125, %v999_v16 }
 0x9aa   :  { %v1005_v18 = vadd.f32 1e-12, %v1003_v17 }
 0x9ab   :  { %v1002_v19 = vpop.xlane.xlu0 %1001 }
 0x9ac   :  { %3113 = vrsqrt.f32 %v1005_v18  ;;  %v1004_v20 = vmul.f32 0.03125, %v1002_v19 }
 0x9ae   :  { %v1006_v21 = vadd.f32 1e-12, %v1004_v20 }
 0x9b0   :  { %3115 = vrsqrt.f32 %v1006_v21 }
 0x9b9   :  { %v3114_v22 = vpop.eup %3113 }
 0x9ba   :  { %v1009_v24 = vmul.f32 %v3114_v22, %v993_v9  ;;  %v3212_v22 = vmov -1.0  }
 0x9bc   :  { %v1017_v26 = vmul.f32 %v2729_v23, %v1009_v24 }
 0x9bd   :  { %v3116_v27 = vpop.eup %3115 }
 0x9be   :  { %v1010_v28 = vmul.f32 %v3116_v27, %v994_v8  ;;  %v3481_v29 = vadd.f32 %v2730_v25, %v1017_v26 }
 0x9c0   :  { %v1018_v30 = vmul.f32 %v2729_v23, %v1010_v28  ;;  %2964 = vmatprep.mubr.msk.f32.mxu1 %vm65_vm0, %v3481_v29 }
 0x9c2   :  { %v3485_v32 = vadd.f32 %v2730_v25, %v1018_v30 }
 0x9c4   :  { %2965 = vmatmul.mubr.msk.f32.vlgmr.msra.gmra.mxu1 %vm65_vm0, %v3485_v32 }
 0xa84   :  { %v2966_v46 = vpop.f32.mrf.mxu1 }
 0xa85   :  { %v1116_v47 = vadd.f32 %v2966_v46, %v2731_v45 }
 0xa86   :  { %v1110_v39 = vpop.f32.mrf.mxu1 }
 0xa87   :  { %v1122_v49 = vmul.f32 0.70710677, %v1116_v47  ;;  %v1111_v50 = vadd.f32 %v2731_v45, %v1110_v39  ;;  %v1120_v38 = vmul.f32 0.5, %v1116_v47 }
 0xa89   :  { %v1128_v51 = vand.u32 2147483647, %v1122_v49  ;;  %v1121_v52 = vmul.f32 0.70710677, %v1111_v50  ;;  %vm1124_vm4 = vcmp.ge.f32.partialorder %v1122_v49, 0.0  ;;  %v1119_v35 = vmul.f32 0.5, %v1111_v50 }
 0xa8a   :  { %v1126_v23 = vsel %vm1124_vm4, 1.0, %v3212_v22 }
 0xa8b   :  { %v1130_v53 = vmul.f32 0.3275911, %v1128_v51  ;;  %v1127_v54 = vand.u32 2147483647, %v1121_v52  ;;  %v1156_v58 = vsub.f32 0.0, %v1128_v51  ;;  %vm1123_vm5 = vcmp.ge.f32.partialorder %v1121_v52, 0.0 }
 0xa8c   :  { %v1125_v27 = vsel %vm1123_vm5, 1.0, %v3212_v22 }
 0xa8d   :  { %v1132_v55 = vadd.f32 1.0, %v1130_v53  ;;  %v1129_v56 = vmul.f32 0.3275911, %v1127_v54  ;;  %v1155_v59 = vsub.f32 0.0, %v1127_v54  ;;  %v1158_v60 = vmul.f32 %v1156_v58, %v1128_v51 }
 0xa8f   :  { %3117 = vrcp.f32 %v1132_v55  ;;  %v1131_v57 = vadd.f32 1.0, %v1129_v56  ;;  %v1157_v62 = vmul.f32 %v1155_v59, %v1127_v54  ;;  %v1161_v0 = vmul.f32 1.442695, %v1158_v60  ;;  %v2741_v60 = vld [vmem:[%s3759_s5 + $0x30] sm:$0xff] }
 0xa91   :  { %3119 = vrcp.f32 %v1131_v57  ;;  %v1159_v4 = vmul.f32 1.442695, %v1157_v62  ;;  %v2739_v62 = vld [vmem:[%s3759_s5 + $0x20] sm:$0xff] }
 0xa92   :  { %3121 = vpow2.f32 %v1161_v0 }
 0xa93   :  { %3123 = vpow2.f32 %v1159_v4 }
 0xa9c   :  { %v3118_v61 = vpop.eup %3117 }
 0xa9d   :  { %v1138_v63 = vmul.f32 1.0614054, %v3118_v61 }
 0xa9e   :  { %v3120_v1 = vpop.eup %3119 }
 0xa9f   :  { %v1140_v2 = vadd.f32 -1.4531521, %v1138_v63  ;;  %v1137_v3 = vmul.f32 1.0614054, %v3120_v1  ;;  %v3122_v16 = vpop.eup %3121 }
 0xaa0   :  { %v3124_v20 = vpop.eup %3123 }
 0xaa1   :  { %v1142_v5 = vmul.f32 %v3118_v61, %v1140_v2  ;;  %v1139_v6 = vadd.f32 -1.4531521, %v1137_v3 }
 0xaa3   :  { %v1144_v7 = vadd.f32 1.4214138, %v1142_v5  ;;  %v1141_v8 = vmul.f32 %v3120_v1, %v1139_v6  ;;  %v2737_v6 = vld [vmem:[%s3769_s15] ss:$0 sm:$0xff] }
 0xaa5   :  { %v1146_v9 = vmul.f32 %v3118_v61, %v1144_v7  ;;  %v1143_v10 = vadd.f32 1.4214138, %v1141_v8 }
 0xaa7   :  { %v1148_v11 = vadd.f32 -0.28449672, %v1146_v9  ;;  %v1145_v12 = vmul.f32 %v3120_v1, %v1143_v10 }
 0xaa9   :  { %v1150_v33 = vmul.f32 %v3118_v61, %v1148_v11  ;;  %v1147_v31 = vadd.f32 -0.28449672, %v1145_v12  ;;  %v2738_v11 = vld [vmem:[%s3770_s16] ss:$0 sm:$0xff] }
 0xaab   :  { %v1152_v13 = vadd.f32 0.2548296, %v1150_v33  ;;  %v1149_v14 = vmul.f32 %v3120_v1, %v1147_v31 }
 0xaad   :  { %v1154_v15 = vmul.f32 %v3118_v61, %v1152_v13  ;;  %v1151_v17 = vadd.f32 0.2548296, %v1149_v14  ;;  %v2740_v61 = vld [vmem:[%s3759_s5 + $0x28] sm:$0xff]  ;;  %v2744_v13 = vld [vmem:[%s3760_s6 + $0x1] ss:$0 sm:$0xff]  ;;  %s2703_s6 = scalar_lea.vmem [#allocation2], %s2802_s24 }
 0xaaf   :  { %v1164_v18 = vmul.f32 %v3122_v16, %v1154_v15  ;;  %v1153_v19 = vmul.f32 %v3120_v1, %v1151_v17 }
 0xab1   :  { %v1166_v21 = vsub.f32 1.0, %v1164_v18  ;;  %v1163_v24 = vmul.f32 %v3124_v20, %v1153_v19 }
 0xab3   :  { %v1168_v25 = vmul.f32 %v1166_v21, %v1126_v23  ;;  %v1165_v26 = vsub.f32 1.0, %v1163_v24 }
 0xab5   :  { %v1167_v28 = vmul.f32 %v1165_v26, %v1125_v27  ;;  %v1170_v30 = vadd.f32 1.0, %v1168_v25 }
 0xab7   :  { %v1169_v36 = vadd.f32 1.0, %v1167_v28  ;;  %v1172_v40 = vmul.f32 %v1170_v30, %v1120_v38 }
 0xab9   :  { %v1171_v37 = vmul.f32 %v1169_v36, %v1119_v35 }
 0xabb   :  { %2983 = vmatprep.mubr.msk.f32.mxu0 %vm1188_vm6, %v1171_v37 }
 0xabc   :  { %2984 = vmatmul.mubr.msk.f32.vlgmr.msra.gmra.mxu0 %vm1188_vm6, %v1172_v40 }
 0xabd   :  { %3009 = vmatprep.mubr.msk.f32.mxu0 %vm3205_vm1, %v3204_v34 }
 0xb7c   :  { %v2985_v42 = vpop.f32.mrf.mxu0 }
 0xb7d   :  { %v1267_v43 = vadd.f32 %v2985_v42, %v2734_v41 }
 0xb7e   :  { %v1261_v45 = vpop.f32.mrf.mxu0 }
 0xb7f   :  { %v1262_v46 = vadd.f32 %v2734_v41, %v1261_v45  ;;  %v1271_v47 = vadd.f32 %v1267_v43, %v3485_v32 }
 0xb81   :  { %v1277_v39 = vsel %vm65_vm0, %v1271_v47, 0.0  ;;  %v1270_v49 = vadd.f32 %v1262_v46, %v3481_v29  ;;  %v2742_v29 = vld [vmem:[%s3759_s5 + $0x38] sm:$0xff] }
 0xb82   :  { %1278 = vadd.xlane.f32.xlu1 %v1277_v39  ;;  %2986 = vmatprep.subr.mxu1 %v2742_v29 }
 0xb83   :  { %v1274_v50 = vsel %vm65_vm0, %v1270_v49, 0.0  ;;  %2987 = vmatpush3.msra.mxu1 %v2742_v29 }
 0xb84   :  { %1275 = vadd.xlane.f32.xlu0 %v1274_v50  ;;  %2988 = vmatprep.subr.mxu1 %v2741_v60 }
 0xb85   :  { %2989 = vmatpush3.msra.mxu1 %v2741_v60 }
 0xb86   :  { %2990 = vmatprep.subr.mxu1 %v2740_v61 }
 0xb87   :  { %2991 = vmatpush3.msra.mxu1 %v2740_v61 }
 0xb88   :  { %2992 = vmatprep.subr.mxu1 %v2739_v62 }
 0xb89   :  { %2993 = vmatpush3.msra.mxu1 %v2739_v62 }
 0xb8a   :  { %2997 = vmatprep.subr.mxu1 %v3204_v34 }
 0xc0b   :  { %v1279_v51 = vpop.xlane.xlu1 %1278 }
 0xc0c   :  { %v1281_v52 = vmul.f32 0.03125, %v1279_v51 }
 0xc0d   :  { %v1276_v53 = vpop.xlane.xlu0 %1275 }
 0xc0e   :  { %v1283_v54 = vsub.f32 %v1271_v47, %v1281_v52  ;;  %v1280_v55 = vmul.f32 0.03125, %v1276_v53 }
 0xc10   :  { %v1282_v56 = vsub.f32 %v1270_v49, %v1280_v55  ;;  %v1285_v57 = vmul.f32 %v1283_v54, %v1283_v54 }
 0xc12   :  { %v1289_v58 = vsel %vm65_vm0, %v1285_v57, 0.0  ;;  %v1284_v59 = vmul.f32 %v1282_v56, %v1282_v56 }
 0xc13   :  { %1290 = vadd.xlane.f32.xlu1 %v1289_v58 }
 0xc14   :  { %v1286_v32 = vsel %vm65_vm0, %v1284_v59, 0.0 }
 0xc15   :  { %1287 = vadd.xlane.f32.xlu0 %v1286_v32 }
 0xc9c   :  { %v1291_v63 = vpop.xlane.xlu1 %1290 }
 0xc9d   :  { %v1293_v0 = vmul.f32 0.03125, %v1291_v63 }
 0xc9e   :  { %v1288_v1 = vpop.xlane.xlu0 %1287 }
 0xc9f   :  { %v1295_v2 = vadd.f32 1e-12, %v1293_v0  ;;  %v1292_v3 = vmul.f32 0.03125, %v1288_v1 }
 0xca1   :  { %3125 = vrsqrt.f32 %v1295_v2  ;;  %v1294_v4 = vadd.f32 1e-12, %v1292_v3 }
 0xca3   :  { %3127 = vrsqrt.f32 %v1294_v4 }
 0xcae   :  { %v3126_v5 = vpop.eup %3125 }
 0xcaf   :  { %v1299_v7 = vmul.f32 %v3126_v5, %v1283_v54 }
 0xcb0   :  { %v3128_v8 = vpop.eup %3127 }
 0xcb1   :  { %v1298_v9 = vmul.f32 %v3128_v8, %v1282_v56  ;;  %v1307_v10 = vmul.f32 %v2737_v6, %v1299_v7 }
 0xcb3   :  { %v1306_v12 = vmul.f32 %v2737_v6, %v1298_v9  ;;  %v3553_v31 = vadd.f32 %v2738_v11, %v1307_v10 }
 0xcb5   :  { %v3551_v33 = vadd.f32 %v2738_v11, %v1306_v12 }
 0xcb7   :  { %2994 = vmatprep.mubr.msk.f32.mxu1 %vm65_vm0, %v3551_v33 }
 0xcb8   :  { %2995 = vmatmul.mubr.msk.f32.vlgmr.msra.gmra.mxu1 %vm65_vm0, %v3553_v31 }
 0xcb9   :  { %2999 = vmatprep.mubr.msk.f32.mxu1 %vm3205_vm1, %v3204_v34 }
 0xd78   :  { %v2996_v14 = vpop.f32.mrf.mxu1 }
 0xd79   :  { %v3564_v15 = vadd.f32 %v2996_v14, %v2744_v13 }
 0xd7a   :  { %v1401_v16 = vpop.f32.mrf.mxu1 }
 0xd7b   :  { %v3566_v17 = vadd.f32 %v2744_v13, %v1401_v16  ;;  %1491 = vrot.lane.b32.xlu1 %v3564_v15, %s3206_s0  ;;  %v1411_v21 = vmul.f32 0.25, %v3564_v15 }
 0xd7d   :  { %1413 = vrot.lane.b32.xlu0 %v3566_v17, %s3206_s0  ;;  %v1410_v19 = vmul.f32 0.25, %v3566_v17  ;;  %s2705_s0 = scalar_lea.vmem [#allocation2], %s2804_s26 }
 0xded   :  { %v1492_v20 = vpop.permute.xlu1 %1491 }
 0xdef   :  { %v1414_v18 = vpop.permute.xlu0 %1413 }
 0xdf0   :  { %2998 = vmatpush3.xpose.msk.msra.mxu1 %vm220_vm2, %v1414_v18 }
 0xdf1   :  { %3002 = vmatprep.subr.mxu1 %v3204_v34 }
 0xdf3   :  { %3000 = vmatmul.mubr.msk.f32.vlgmr.msra.gmra.mxu1 %vm220_vm2, %v1410_v19 }
 0xdf4   :  { %3003 = vmatpush3.xpose.msk.msra.mxu1 %vm220_vm2, %v1492_v20  ;;  %3004 = vmatprep.mubr.msk.f32.mxu1 %vm3205_vm1, %v3204_v34 }
 0xdf5   :  { %3012 = vmatprep.subr.mxu1 %v3204_v34 }
 0xdf7   :  { %3005 = vmatmul.mubr.msk.f32.vlgmr.msra.gmra.mxu1 %vm220_vm2, %v1411_v21 }
 0xdf8   :  { %3014 = vmatprep.mubr.msk.f32.mxu1 %vm3205_vm1, %v3204_v34 }
 0xeb3   :  { %v1486_v23 = vpop.f32.mrf.mxu1 }
 0xeb4   :  { %v1487_v24 = vadd.f32 %v3377_v44, %v1486_v23  ;;  %v2762_v23 = vld [vmem:[%s3761_s7 + $0x38] sm:$0xff] }
 0xeb5   :  { %v3001_v25 = vpop.f32.mrf.mxu1 }
 0xeb6   :  { %v1568_v26 = vsel %vm374_vm3, %v1487_v24, -inf  ;;  %v2759_v25 = vld [vmem:[%s3761_s7 + $0x20] sm:$0xff] }
 0xeb7   :  { %1569 = vmax.xlane.f32.xlu1 %v1568_v26  ;;  %v1564_v27 = vpop.f32.mrf.mxu1 }
 0xeb8   :  { %v1565_v28 = vadd.f32 %v3383_v48, %v1564_v27 }
 0xeb9   :  { %v3006_v30 = vpop.f32.mrf.mxu1 }
 0xeba   :  { %v1571_v35 = vsel %vm374_vm3, %v1565_v28, -inf }
 0xebb   :  { %1572 = vmax.xlane.f32.xlu0 %v1571_v35 }
 0xec8   :  { %1666 = vrot.lane.b32.xlu1 %v3564_v15, %s3207_s1 }
 0xecc   :  { %1744 = vrot.lane.b32.xlu1 %v3566_v17, %s3208_s20 }
 0xed0   :  { %1822 = vrot.lane.b32.xlu1 %v3564_v15, %s3208_s20 }
 0xf40   :  { %v1570_v36 = vpop.xlane.xlu1 %1569 }
 0xf41   :  { %v1574_v38 = vsub.f32 %v1487_v24, %v1570_v36  ;;  %v2760_v24 = vld [vmem:[%s3761_s7 + $0x28] sm:$0xff] }
 0xf43   :  { %v1576_v37 = vmul.f32 1.442695, %v1574_v38 }
 0xf44   :  { %v1667_v40 = vpop.permute.xlu1 %1666  ;;  %v1573_v41 = vpop.xlane.xlu0 %1572 }
 0xf45   :  { %3129 = vpow2.f32 %v1576_v37  ;;  %v1575_v42 = vsub.f32 %v1565_v28, %v1573_v41  ;;  %3013 = vmatpush3.msra.mxu1 %v1667_v40  ;;  %v2764_v40 = vld [vmem:[%s3762_s8 + $0x1] ss:$0 sm:$0xff] }
 0xf46   :  { %3022 = vmatprep.subr.mxu1 %v3204_v34 }
 0xf47   :  { %v1578_v43 = vmul.f32 1.442695, %v1575_v42 }
 0xf48   :  { %v1745_v49 = vpop.permute.xlu1 %1744 }
 0xf49   :  { %3131 = vpow2.f32 %v1578_v43 }
 0xf4c   :  { %v1823_v50 = vpop.permute.xlu1 %1822 }
 0xf52   :  { %v3130_v45 = vpop.eup %3129 }
 0xf53   :  { %v1580_v46 = vsel %vm374_vm3, %v3130_v45, 0.0 }
 0xf54   :  { %1581 = vadd.xlane.f32.xlu0 %v1580_v46 }
 0xf56   :  { %v3132_v47 = vpop.eup %3131 }
 0xf57   :  { %v1583_v39 = vsel %vm374_vm3, %v3132_v47, 0.0 }
 0xf58   :  { %1584 = vadd.xlane.f32.xlu1 %v1583_v39 }
 0xf69   :  { %1820 = vrot.lane.b32.xlu1 %v1411_v21, %s3209_s2 }
 0xf6a   :  { %1590 = vrot.lane.b32.xlu0 %v3566_v17, %s3207_s1  ;;  %s2526_s1 = scalar_lea.vmem [#allocation2], %s2795_s27 }
 0xf6e   :  { %1742 = vrot.lane.b32.xlu0 %v1410_v19, %s3209_s2 }
 0xfdd   :  { %v1582_v51 = vpop.xlane.xlu0 %1581 }
 0xfde   :  { %3133 = vrcp.f32 %v1582_v51 }
 0xfe1   :  { %v1585_v52 = vpop.xlane.xlu1 %1584  ;;  %v1591_v53 = vpop.permute.xlu0 %1590 }
 0xfe2   :  { %3135 = vrcp.f32 %v1585_v52  ;;  %3008 = vmatpush3.msra.mxu0 %v1591_v53 }
 0xfe3   :  { %3017 = vmatprep.subr.mxu0 %v3204_v34 }
 0xfe5   :  { %v1743_v58 = vpop.permute.xlu0 %1742  ;;  %v1821_v59 = vpop.permute.xlu1 %1820 }
 0xfeb   :  { %v3134_v54 = vpop.eup %3133 }
 0xfec   :  { %v1588_v55 = vmul.f32 %v3134_v54, %v3130_v45 }
 0xfee   :  { %3010 = vmatmul.mubr.msk.f32.vlgmr.msra.gmra.mxu0 %vm374_vm3, %v1588_v55 }
 0xfef   :  { %v3136_v56 = vpop.eup %3135  ;;  %3018 = vmatpush3.xpose.msk.msra.mxu0 %vm220_vm2, %v1745_v49  ;;  %3019 = vmatprep.mubr.msk.f32.mxu0 %vm3205_vm1, %v3204_v34 }
 0xff0   :  { %v1589_v57 = vmul.f32 %v3136_v56, %v3132_v47  ;;  %3027 = vmatprep.subr.mxu0 %v3204_v34 }
 0xff2   :  { %3015 = vmatmul.mubr.msk.f32.vlgmr.msra.gmra.mxu1 %vm374_vm3, %v1589_v57  ;;  %3020 = vmatmul.mubr.msk.f32.vlgmr.msra.gmra.mxu0 %vm220_vm2, %v1743_v58 }
 0xff3   :  { %3023 = vmatpush3.xpose.msk.msra.mxu1 %vm220_vm2, %v1823_v50  ;;  %3024 = vmatprep.mubr.msk.f32.mxu1 %vm3205_vm1, %v3204_v34 }
 0xff4   :  { %3032 = vmatprep.subr.mxu1 %v3204_v34  ;;  %3029 = vmatprep.mubr.msk.f32.mxu0 %vm3205_vm1, %v3204_v34 }
 0xff6   :  { %3025 = vmatmul.mubr.msk.f32.vlgmr.msra.gmra.mxu1 %vm220_vm2, %v1821_v59  ;;  %v2773_v59 = vld [vmem:[%s3765_s11 + $0x30] sm:$0xff] }
 0xff7   :  { %3034 = vmatprep.mubr.msk.f32.mxu1 %vm3205_vm1, %v3204_v34 }
0x10ae   :  { %v3618_v32 = vpop.f32.mrf.mxu0 }
0x10b0   :  { %v3011_v29 = vpop.f32.mrf.mxu0 }
0x10b1   :  { %v2771_v29 = vld [vmem:[%s3765_s11 + $0x20] sm:$0xff] }
0x10b2   :  { %v3620_v60 = vpop.f32.mrf.mxu1  ;;  %v1816_v61 = vpop.f32.mrf.mxu0 }
0x10b3   :  { %v1817_v62 = vadd.f32 %v3377_v44, %v1816_v61 }
0x10b4   :  { %v3016_v63 = vpop.f32.mrf.mxu1  ;;  %v3021_v0 = vpop.f32.mrf.mxu0 }
0x10b5   :  { %v1898_v1 = vsel %vm374_vm3, %v1817_v62, -inf }
0x10b6   :  { %1899 = vmax.xlane.f32.xlu0 %v1898_v1  ;;  %v1894_v2 = vpop.f32.mrf.mxu1 }
0x10b7   :  { %v1895_v3 = vadd.f32 %v3383_v48, %v1894_v2 }
0x10b8   :  { %v3026_v4 = vpop.f32.mrf.mxu1 }
0x10b9   :  { %v1901_v5 = vsel %vm374_vm3, %v1895_v3, -inf }
0x10ba   :  { %1902 = vmax.xlane.f32.xlu1 %v1901_v5  ;;  %v2770_v5 = vld [vmem:[%s3779_s30 + $0x1] ss:$0 sm:$0xff]  ;;  %s2520_s30 = sld [smem:[#allocation6]] }
0x10cb   :  { %1996 = vrot.lane.b32.xlu1 %v3564_v15, %s3210_s21 }
0x113f   :  { %v1900_v34 = vpop.xlane.xlu0 %1899 }
0x1140   :  { %v1904_v6 = vsub.f32 %v1817_v62, %v1900_v34 }
0x1142   :  { %v1906_v7 = vmul.f32 1.442695, %v1904_v6 }
0x1143   :  { %v1903_v8 = vpop.xlane.xlu1 %1902 }
0x1144   :  { %3137 = vpow2.f32 %v1906_v7  ;;  %v1905_v44 = vsub.f32 %v1895_v3, %v1903_v8  ;;  %v2769_v3 = vld [vmem:[%s3763_s9 + $0x1] ss:$0 sm:$0xff]  ;;  %s2796_s9 = sld [smem:[#allocation6 + $0x2]] }
0x1146   :  { %v1908_v9 = vmul.f32 1.442695, %v1905_v44 }
0x1147   :  { %v1997_v10 = vpop.permute.xlu1 %1996 }
0x1148   :  { %3139 = vpow2.f32 %v1908_v9  ;;  %3033 = vmatpush3.msra.mxu1 %v1997_v10  ;;  %v2786_v10 = vld [vmem:[%s3767_s13 + $0x78] sm:$0xff] }
0x114a   :  { %s2530_s20 = scalar_lea.vmem [#allocation2], %s2796_s9 }
0x1151   :  { %v3138_v11 = vpop.eup %3137 }
0x1152   :  { %v1910_v48 = vsel %vm374_vm3, %v3138_v11, 0.0 }
0x1153   :  { %1911 = vadd.xlane.f32.xlu0 %v1910_v48  ;;  %v2784_v48 = vld [vmem:[%s3767_s13 + $0x68] sm:$0xff] }
0x1155   :  { %v3140_v12 = vpop.eup %3139 }
0x1156   :  { %v1913_v13 = vsel %vm374_vm3, %v3140_v12, 0.0 }
0x1157   :  { %1914 = vadd.xlane.f32.xlu0 %v1913_v13  ;;  %v2782_v13 = vld [vmem:[%s3767_s13 + $0x58] sm:$0xff] }
0x116d   :  { %1920 = vrot.lane.b32.xlu0 %v3566_v17, %s3210_s21  ;;  %v2761_v17 = vld [vmem:[%s3761_s7 + $0x30] sm:$0xff]  ;;  %s2521_s21 = scalar_lea.vmem [#allocation2], %s2520_s30  ;;  %s2687_s7 = sshll.u32 %s3215_s29, 4  ;;  %s2688_s7 = int_to_ptr.vmem [resolvable:$true] %s2687_s7 }
0x116e   :  { %s3179_s4 = scalar_lea.vmem %s2688_s7, 32  ;;  %p3184_p6 = scmp.lt.s32.totalorder %s2688_s7, %s2688_s7 }
0x116f   :  { %p3180_p5 = scmp.ne.s32.totalorder %s2688_s7, %s3179_s4  ;;  %p3185_p7 = scmp.lt.s32.totalorder %s3179_s4, %s3179_s4 }
0x1171   :  { %p3186_p8 = por %p3185_p7, %p3184_p6 }
0x1173   :  { %p3187_p9 = pnand %p3186_p8, %p3180_p5 }
0x11dc   :  { %v1912_v14 = vpop.xlane.xlu0 %1911 }
0x11dd   :  { %3141 = vrcp.f32 %v1912_v14  ;;  %v2781_v14 = vld [vmem:[%s3767_s13 + $0x50] sm:$0xff] }
0x11e0   :  { %v1915_v15 = vpop.xlane.xlu0 %1914 }
0x11e1   :  { %3143 = vrcp.f32 %v1915_v15  ;;  %v2780_v15 = vld [vmem:[%s3767_s13 + $0x48] sm:$0xff] }
0x11e4   :  { %v1921_v16 = vpop.permute.xlu0 %1920 }
0x11e5   :  { %3028 = vmatpush3.msra.mxu0 %v1921_v16  ;;  %v2779_v16 = vld [vmem:[%s3767_s13 + $0x40] sm:$0xff] }
0x11e6   :  { %3037 = vmatprep.subr.mxu0 %v2762_v23 }
0x11ea   :  { %v3142_v18 = vpop.eup %3141 }
0x11eb   :  { %v1918_v19 = vmul.f32 %v3142_v18, %v3138_v11  ;;  %v2785_v11 = vld [vmem:[%s3767_s13 + $0x70] sm:$0xff]  ;;  %v2776_v18 = vld [vmem:[%s3766_s12 + $0x1] ss:$0 sm:$0xff] }
0x11ed   :  { %3030 = vmatmul.mubr.msk.f32.vlgmr.msra.gmra.mxu0 %vm374_vm3, %v1918_v19 }
0x11ee   :  { %v3144_v20 = vpop.eup %3143  ;;  %3038 = vmatpush3.msra.mxu0 %v2762_v23 }
0x11ef   :  { %v1919_v21 = vmul.f32 %v3144_v20, %v3140_v12  ;;  %3039 = vmatprep.subr.mxu0 %v2761_v17  ;;  %v2783_v12 = vld [vmem:[%s3767_s13 + $0x60] sm:$0xff] }
0x11f0   :  { %3040 = vmatpush3.msra.mxu0 %v2761_v17 }
0x11f1   :  { %3035 = vmatmul.mubr.msk.f32.vlgmr.msra.gmra.mxu1 %vm374_vm3, %v1919_v21  ;;  %3041 = vmatprep.subr.mxu0 %v2760_v24 }
0x11f2   :  { %3042 = vmatpush3.msra.mxu0 %v2760_v24 }
0x11f3   :  { %3043 = vmatprep.subr.mxu0 %v2759_v25 }
0x11f4   :  { %3044 = vmatpush3.msra.mxu0 %v2759_v25 }
0x11f5   :  { %3059 = vmatprep.subr.mxu0 %v2786_v10 }
0x12ad   :  { %v1992_v26 = vpop.f32.mrf.mxu0 }
0x12ae   :  { %2074 = vrot.lane.b32.xlu1 %v1992_v26, %s3211_s3 }
0x12af   :  { %v3031_v27 = vpop.f32.mrf.mxu0 }
0x12b1   :  { %v2068_v28 = vpop.f32.mrf.mxu1 }
0x12b2   :  { %2076 = vrot.lane.b32.xlu1 %v2068_v28, %s3211_s3 }
0x12b3   :  { %v3036_v30 = vpop.f32.mrf.mxu1 }
0x1320   :  { %v2075_v35 = vpop.permute.xlu1 %2074 }
0x1321   :  { %v2080_v36 = vsel %vm220_vm2, %v3618_v32, %v2075_v35  ;;  %v2772_v32 = vld [vmem:[%s3765_s11 + $0x28] sm:$0xff] }
0x1322   :  { %3045 = vmatprep.mubr.msk.f32.mxu0 %vm65_vm0, %v2080_v36 }
0x1324   :  { %v2077_v38 = vpop.permute.xlu1 %2076 }
0x1325   :  { %v2081_v37 = vsel %vm220_vm2, %v3620_v60, %v2077_v38 }
0x1326   :  { %3046 = vmatmul.mubr.msk.f32.vlgmr.msra.gmra.mxu0 %vm65_vm0, %v2081_v37 }
0x1327   :  { %3060 = vmatpush3.msra.mxu0 %v2786_v10 }
0x1328   :  { %3061 = vmatprep.subr.mxu0 %v2785_v11 }
0x1329   :  { %3062 = vmatpush3.msra.mxu0 %v2785_v11 }
0x132a   :  { %3063 = vmatprep.subr.mxu0 %v2784_v48 }
0x132b   :  { %3064 = vmatpush3.msra.mxu0 %v2784_v48  ;;  %v2788_v48 = vld [vmem:[%s3768_s14 + $0x1] ss:$0 sm:$0xff] }
0x132c   :  { %3065 = vmatprep.subr.mxu0 %v2783_v12 }
0x132d   :  { %3066 = vmatpush3.msra.mxu0 %v2783_v12 }
0x132e   :  { %3067 = vmatprep.subr.mxu0 %v2782_v13 }
0x132f   :  { %3068 = vmatpush3.msra.mxu0 %v2782_v13 }
0x1330   :  { %3069 = vmatprep.subr.mxu0 %v2781_v14 }
0x1331   :  { %3070 = vmatpush3.msra.mxu0 %v2781_v14 }
0x1332   :  { %3071 = vmatprep.subr.mxu0 %v2780_v15 }
0x1333   :  { %3072 = vmatpush3.msra.mxu0 %v2780_v15 }
0x1334   :  { %3073 = vmatprep.subr.mxu0 %v2779_v16 }
0x1335   :  { %3074 = vmatpush3.msra.mxu0 %v2779_v16 }
0x13e6   :  { %v3047_v41 = vpop.f32.mrf.mxu0 }
0x13e7   :  { %v2173_v42 = vadd.f32 %v3047_v41, %v2764_v40 }
0x13e8   :  { %v2167_v43 = vpop.f32.mrf.mxu0 }
0x13e9   :  { %v2168_v45 = vadd.f32 %v2764_v40, %v2167_v43  ;;  %v2177_v46 = vadd.f32 %v2173_v42, %v3553_v31 }
0x13eb   :  { %v2185_v47 = vsel %vm65_vm0, %v2177_v46, 0.0  ;;  %v2176_v39 = vadd.f32 %v2168_v45, %v3551_v33  ;;  %v2774_v33 = vld [vmem:[%s3765_s11 + $0x38] sm:$0xff]  ;;  %s2797_s11 = sld [smem:[#allocation6 + $0x3]] }
0x13ec   :  { %2186 = vadd.xlane.f32.xlu1 %v2185_v47  ;;  %3048 = vmatprep.subr.mxu1 %v2774_v33 }
0x13ed   :  { %v2182_v49 = vsel %vm65_vm0, %v2176_v39, 0.0  ;;  %3049 = vmatpush3.msra.mxu1 %v2774_v33 }
0x13ee   :  { %2183 = vadd.xlane.f32.xlu0 %v2182_v49  ;;  %3050 = vmatprep.subr.mxu1 %v2773_v59 }
0x13ef   :  { %3051 = vmatpush3.msra.mxu1 %v2773_v59 }
0x13f0   :  { %3052 = vmatprep.subr.mxu1 %v2772_v32 }
0x13f1   :  { %3053 = vmatpush3.msra.mxu1 %v2772_v32  ;;  %s2534_s2 = scalar_lea.vmem [#allocation2], %s2797_s11 }
0x13f2   :  { %3054 = vmatprep.subr.mxu1 %v2771_v29 }
0x13f3   :  { %3055 = vmatpush3.msra.mxu1 %v2771_v29 }
0x1475   :  { %v2187_v50 = vpop.xlane.xlu1 %2186 }
0x1476   :  { %v2189_v51 = vmul.f32 0.03125, %v2187_v50 }
0x1477   :  { %v2184_v52 = vpop.xlane.xlu0 %2183 }
0x1478   :  { %v2188_v53 = vmul.f32 0.03125, %v2184_v52  ;;  %v2191_v54 = vsub.f32 %v2177_v46, %v2189_v51 }
0x147a   :  { %v2190_v55 = vsub.f32 %v2176_v39, %v2188_v53  ;;  %v2193_v58 = vmul.f32 %v2191_v54, %v2191_v54 }
0x147c   :  { %v2192_v56 = vmul.f32 %v2190_v55, %v2190_v55  ;;  %v2197_v31 = vsel %vm65_vm0, %v2193_v58, 0.0 }
0x147e   :  { %v2194_v57 = vsel %vm65_vm0, %v2192_v56, 0.0 }
0x147f   :  { %2195 = vadd.xlane.f32.xlu0 %v2194_v57 }
0x1483   :  { %2198 = vadd.xlane.f32.xlu0 %v2197_v31 }
0x1508   :  { %v2196_v60 = vpop.xlane.xlu0 %2195 }
0x1509   :  { %v2200_v61 = vmul.f32 0.03125, %v2196_v60 }
0x150b   :  { %v2202_v62 = vadd.f32 1e-12, %v2200_v61 }
0x150c   :  { %v2199_v63 = vpop.xlane.xlu0 %2198 }
0x150d   :  { %3145 = vrsqrt.f32 %v2202_v62  ;;  %v2201_v0 = vmul.f32 0.03125, %v2199_v63 }
0x150f   :  { %v2203_v1 = vadd.f32 1e-12, %v2201_v0 }
0x1511   :  { %3147 = vrsqrt.f32 %v2203_v1 }
0x151a   :  { %v3146_v2 = vpop.eup %3145 }
0x151b   :  { %v2206_v4 = vmul.f32 %v3146_v2, %v2190_v55 }
0x151d   :  { %v2214_v34 = vmul.f32 %v2769_v3, %v2206_v4 }
0x151e   :  { %v3148_v6 = vpop.eup %3147 }
0x151f   :  { %v2207_v7 = vmul.f32 %v3148_v6, %v2191_v54  ;;  %v3681_v8 = vadd.f32 %v2770_v5, %v2214_v34 }
0x1521   :  { %v2215_v44 = vmul.f32 %v2769_v3, %v2207_v7  ;;  %3056 = vmatprep.mubr.msk.f32.mxu1 %vm65_vm0, %v3681_v8 }
0x1523   :  { %v3685_v9 = vadd.f32 %v2770_v5, %v2215_v44 }
0x1525   :  { %3057 = vmatmul.mubr.msk.f32.vlgmr.msra.gmra.mxu1 %vm65_vm0, %v3685_v9 }
0x15e5   :  { %v3058_v19 = vpop.f32.mrf.mxu1 }
0x15e6   :  { %v2315_v20 = vadd.f32 %v3058_v19, %v2776_v18 }
0x15e7   :  { %v2309_v21 = vpop.f32.mrf.mxu1 }
0x15e8   :  { %v2321_v23 = vmul.f32 0.70710677, %v2315_v20  ;;  %v2310_v17 = vadd.f32 %v2776_v18, %v2309_v21  ;;  %v2319_v44 = vmul.f32 0.5, %v2315_v20 }
0x15ea   :  { %v2327_v24 = vand.u32 2147483647, %v2321_v23  ;;  %v2320_v25 = vmul.f32 0.70710677, %v2310_v17  ;;  %vm2323_vm7 = vcmp.ge.f32.partialorder %v2321_v23, 0.0  ;;  %v2318_v6 = vmul.f32 0.5, %v2310_v17 }
0x15eb   :  { %v2325_v0 = vsel %vm2323_vm7, 1.0, %v3212_v22 }
0x15ec   :  { %v2329_v26 = vmul.f32 0.3275911, %v2327_v24  ;;  %v2326_v27 = vand.u32 2147483647, %v2320_v25  ;;  %v2355_v36 = vsub.f32 0.0, %v2327_v24  ;;  %vm2322_vm8 = vcmp.ge.f32.partialorder %v2320_v25, 0.0 }
0x15ed   :  { %v2324_v4 = vsel %vm2322_vm8, 1.0, %v3212_v22 }
0x15ee   :  { %v2331_v28 = vadd.f32 1.0, %v2329_v26  ;;  %v2328_v30 = vmul.f32 0.3275911, %v2326_v27  ;;  %v2354_v38 = vsub.f32 0.0, %v2326_v27  ;;  %v2357_v37 = vmul.f32 %v2355_v36, %v2327_v24 }
0x15f0   :  { %3149 = vrcp.f32 %v2331_v28  ;;  %v2330_v35 = vadd.f32 1.0, %v2328_v30  ;;  %v2356_v41 = vmul.f32 %v2354_v38, %v2326_v27  ;;  %v2360_v43 = vmul.f32 1.442695, %v2357_v37 }
0x15f2   :  { %3151 = vrcp.f32 %v2330_v35  ;;  %v2358_v39 = vmul.f32 1.442695, %v2356_v41  ;;  %v2793_v41 = vld [vmem:[%s3769_s15 + $0x1] ss:$0 sm:$0xff]  ;;  %s2798_s15 = sld [smem:[#allocation6 + $0x4]] }
0x15f3   :  { %3153 = vpow2.f32 %v2360_v43 }
0x15f4   :  { %3155 = vpow2.f32 %v2358_v39 }
0x15f8   :  { %s2699_s28 = scalar_lea.vmem [#allocation2], %s2798_s15 }
0x15fd   :  { %v3150_v40 = vpop.eup %3149 }
0x15fe   :  { %v2337_v42 = vmul.f32 1.0614054, %v3150_v40 }
0x15ff   :  { %v3152_v45 = vpop.eup %3151 }
0x1600   :  { %v2339_v46 = vadd.f32 -1.4531521, %v2337_v42  ;;  %v2336_v47 = vmul.f32 1.0614054, %v3152_v45  ;;  %v3154_v32 = vpop.eup %3153 }
0x1601   :  { %v3156_v62 = vpop.eup %3155 }
0x1602   :  { %v2341_v49 = vmul.f32 %v3150_v40, %v2339_v46  ;;  %v2338_v50 = vadd.f32 -1.4531521, %v2336_v47 }
0x1604   :  { %v2343_v51 = vadd.f32 1.4214138, %v2341_v49  ;;  %v2340_v52 = vmul.f32 %v3152_v45, %v2338_v50 }
0x1606   :  { %v2345_v53 = vmul.f32 %v3150_v40, %v2343_v51  ;;  %v2342_v54 = vadd.f32 1.4214138, %v2340_v52  ;;  %v3213_v51 = vmov 1966171168  }
0x1607   :  { %v2563_v52 = vunpack.c.l.s4 %v3213_v51 }
0x1608   :  { %v2347_v55 = vadd.f32 -0.28449672, %v2345_v53  ;;  %v2344_v56 = vmul.f32 %v3152_v45, %v2342_v54  ;;  %v2565_v53 = vlaneseq }
0x160a   :  { %v2349_v57 = vmul.f32 %v3150_v40, %v2347_v55  ;;  %v2346_v58 = vadd.f32 -0.28449672, %v2344_v56 }
0x160c   :  { %v2351_v31 = vadd.f32 0.2548296, %v2349_v57  ;;  %v2348_v33 = vmul.f32 %v3152_v45, %v2346_v58 }
0x160e   :  { %v2353_v59 = vmul.f32 %v3150_v40, %v2351_v31  ;;  %v2350_v29 = vadd.f32 0.2548296, %v2348_v33 }
0x1610   :  { %v2363_v60 = vmul.f32 %v3154_v32, %v2353_v59  ;;  %v2352_v61 = vmul.f32 %v3152_v45, %v2350_v29  ;;  %v2794_v45 = vld [vmem:[%s3770_s16 + $0x1] ss:$0 sm:$0xff]  ;;  %s2701_s16 = scalar_lea.vmem [#allocation2], %s2800_s23  ;;  %v2564_v32 = vunpack.c.0.s8 %v2563_v52  ;;  %v2566_v29 = vshrl.u32 %v2565_v53, 7 }
0x1612   :  { %v2365_v63 = vsub.f32 1.0, %v2363_v60  ;;  %v2362_v1 = vmul.f32 %v3156_v62, %v2352_v61  ;;  %v2567_v60 = vsub.s32 %v2564_v32, %v2566_v29 }
0x1614   :  { %v2367_v2 = vmul.f32 %v2365_v63, %v2325_v0  ;;  %v2364_v3 = vsub.f32 1.0, %v2362_v1 }
0x1616   :  { %v2366_v5 = vmul.f32 %v2364_v3, %v2324_v4  ;;  %v2369_v34 = vadd.f32 1.0, %v2367_v2  ;;  %v2586_v4 = vsub.s32 0, %v2566_v29 }
0x1618   :  { %v2368_v7 = vadd.f32 1.0, %v2366_v5  ;;  %v2371_v11 = vmul.f32 %v2369_v34, %v2319_v44 }
0x161a   :  { %v2370_v10 = vmul.f32 %v2368_v7, %v2318_v6 }
0x161c   :  { %3075 = vmatprep.mubr.msk.f32.mxu0 %vm1188_vm6, %v2370_v10 }
0x161d   :  { %3076 = vmatmul.mubr.msk.f32.vlgmr.msra.gmra.mxu0 %vm1188_vm6, %v2371_v11 }
0x16dd   :  { %v3077_v12 = vpop.f32.mrf.mxu0 }
0x16de   :  { %v2467_v13 = vadd.f32 %v3077_v12, %v2788_v48 }
0x16df   :  { %v2461_v14 = vpop.f32.mrf.mxu0 }
0x16e0   :  { %v2462_v15 = vadd.f32 %v2788_v48, %v2461_v14  ;;  %v2471_v22 = vadd.f32 %v2467_v13, %v3685_v9 }
0x16e2   :  { %v2479_v16 = vsel %vm65_vm0, %v2471_v22, 0.0  ;;  %v2470_v18 = vadd.f32 %v2462_v15, %v3681_v8 }
0x16e3   :  { %2480 = vadd.xlane.f32.xlu1 %v2479_v16 }
0x16e4   :  { %v2476_v19 = vsel %vm65_vm0, %v2470_v18, 0.0 }
0x16e5   :  { %2477 = vadd.xlane.f32.xlu0 %v2476_v19 }
0x176c   :  { %v2481_v20 = vpop.xlane.xlu1 %2480 }
0x176d   :  { %v2483_v21 = vmul.f32 0.03125, %v2481_v20 }
0x176e   :  { %v2478_v23 = vpop.xlane.xlu0 %2477 }
0x176f   :  { %v2485_v17 = vsub.f32 %v2471_v22, %v2483_v21  ;;  %v2482_v24 = vmul.f32 0.03125, %v2478_v23  ;;  %v2619_v22 = vand.u32 127, %v2565_v53 }
0x1771   :  { %v2484_v25 = vsub.f32 %v2470_v18, %v2482_v24  ;;  %v2487_v26 = vmul.f32 %v2485_v17, %v2485_v17  ;;  %v2622_v16 = vsub.s32 %v2619_v22, %v2566_v29 }
0x1773   :  { %v2491_v27 = vsel %vm65_vm0, %v2487_v26, 0.0  ;;  %v2486_v28 = vmul.f32 %v2484_v25, %v2484_v25 }
0x1774   :  { %2492 = vadd.xlane.f32.xlu1 %v2491_v27 }
0x1775   :  { %v2488_v9 = vsel %vm65_vm0, %v2486_v28, 0.0  ;;  %v2650_v28 = vsub.s32 1, %v2566_v29 }
0x1776   :  { %2489 = vadd.xlane.f32.xlu0 %v2488_v9 }
0x17fd   :  { %v2493_v30 = vpop.xlane.xlu1 %2492 }
0x17fe   :  { %v2495_v8 = vmul.f32 0.03125, %v2493_v30 }
0x17ff   :  { %v2490_v35 = vpop.xlane.xlu0 %2489 }
0x1800   :  { %v2497_v36 = vadd.f32 1e-12, %v2495_v8  ;;  %v2494_v38 = vmul.f32 0.03125, %v2490_v35 }
0x1802   :  { %3157 = vrsqrt.f32 %v2497_v36  ;;  %v2496_v37 = vadd.f32 1e-12, %v2494_v38  ;;  %v3214_v38 = vmov 0  }
0x1803   :  { %3092 = vset.pattern.permute.xlu0 %v3214_v38  ;;  %3091 = vset.pattern.permute.xlu1 %v3214_v38 }
0x1804   :  { %3159 = vrsqrt.f32 %v2496_v37 }
0x180f   :  { %v3158_v40 = vpop.eup %3157 }
0x1810   :  { %v2501_v42 = vmul.f32 %v3158_v40, %v2485_v17 }
0x1811   :  { %v3160_v43 = vpop.eup %3159 }
0x1812   :  { %v2509_v46 = vmul.f32 %v2793_v41, %v2501_v42  ;;  %v2500_v47 = vmul.f32 %v3160_v43, %v2484_v25 }
0x1814   :  { %v2517_v39 = vadd.f32 %v2794_v45, %v2509_v46  ;;  %v2508_v49 = vmul.f32 %v2793_v41, %v2500_v47 }
0x1816   :  { %2519 = vst.msk [vmem:[#allocation2 + $0x8] sm:$0xff] %vm65_vm0, %v2517_v39  ;;  %v2516_v50 = vadd.f32 %v2794_v45, %v2508_v49 }
0x1818   :  { %2518 = vst.msk [vmem:[#allocation2] sm:$0xff] %vm65_vm0, %v2516_v50 }
0x181f   :  { %v2801_v54 = vld [vmem:[%s2701_s16 + $0x8] sm:$0x1]  ;;  %v2527_v57 = vld [vmem:[%s2526_s1] sm:$0x1] }
0x1820   :  { %v2803_v55 = vld [vmem:[%s2703_s6 + $0x8] sm:$0x1]  ;;  %2547 = vst.msk [vmem:[#allocation4 + $0x4] sm:$0x1] %vm2523_vm9, %v2801_v54  ;;  %v2531_v58 = vld [vmem:[%s2530_s20] sm:$0x1] }
0x1821   :  { %v2805_v56 = vld [vmem:[%s2705_s0 + $0x8] sm:$0x1]  ;;  %2552 = vst.msk [vmem:[#allocation4 + $0x5] sm:$0x1] %vm2523_vm9, %v2803_v55  ;;  %v2535_v31 = vld [vmem:[%s2534_s2] sm:$0x1] }
0x1822   :  { %2557 = vst.msk [vmem:[#allocation4 + $0x6] sm:$0x1] %vm2523_vm9, %v2805_v56  ;;  %2528 = vst.msk [vmem:[#allocation4] sm:$0x1] %vm2523_vm9, %v2527_v57  ;;  %v2522_v33 = vld [vmem:[%s2521_s21] sm:$0x1] }
0x1823   :  { %2532 = vst.msk [vmem:[#allocation4 + $0x1] sm:$0x1] %vm2523_vm9, %v2531_v58  ;;  %2536 = vst.msk [vmem:[#allocation4 + $0x2] sm:$0x1] %vm2523_vm9, %v2535_v31  ;;  %v2799_v59 = vld [vmem:[%s2699_s28 + $0x8] sm:$0x1] }
0x1824   :  { %2524 = vst.msk [vmem:[#allocation3] sm:$0x1] %vm2523_vm9, %v2522_v33  ;;  %2541 = vst.msk [vmem:[#allocation3 + $0x1] sm:$0x1] %vm2523_vm9, %v2799_v59 }
0x1829   :  { %v2560_v61 = vld [vmem:[#allocation4 + $0x4] sm:$0x7] }
0x182a   :  { %v2609_v62 = vmul.f32 %v2560_v61, %v2560_v61  ;;  %v2559_v63 = vld [vmem:[#allocation4] sm:$0x7] }
0x182b   :  { %v2608_v0 = vmul.f32 %v2559_v63, %v2559_v63  ;;  %v2558_v1 = vld [vmem:[#allocation3] sm:$0x3] }
0x182c   :  { %v2613_v2 = vsel %vm2596_vm10, %v2609_v62, 0.0  ;;  %v2568_v3 = vrot.slane %v2558_v1, %v2567_v60  ;;  %v2603_v34 = vmul.f32 %v2558_v1, %v2558_v1 }
0x182d   :  { %2614 = vadd.xlane.f32.xlu1 %v2613_v2  ;;  %v2610_v5 = vsel %vm2596_vm10, %v2608_v0, 0.0 }
0x182e   :  { %2611 = vadd.xlane.f32.xlu0 %v2610_v5  ;;  %v2569_v6 = vcombine.high %v2568_v3, %v2568_v3  ;;  %v2576_v7 = vrot.slane %v2568_v3, %v2567_v60  ;;  %v2605_v11 = vsel %vm2604_vm11, %v2603_v34, 0.0 }
0x1830   :  { %v2583_v44 = vrot.slane %v2569_v6, %v2567_v60  ;;  %v2587_v10 = vrot.slane %v2576_v7, %v2586_v4 }
0x1832   :  { %2606 = vadd.xlane.f32.xlu0 %v2605_v11  ;;  %v2591_v48 = vrot.slane %v2583_v44, %v2586_v4  ;;  %v2594_v12 = vmul.f32 %v2587_v10, %v2559_v63 }
0x1834   :  { %v2595_v13 = vmul.f32 %v2591_v48, %v2560_v61  ;;  %v2597_v14 = vsel %vm2596_vm10, %v2594_v12, 0.0 }
0x1836   :  { %v2600_v15 = vsel %vm2596_vm10, %v2595_v13, 0.0 }
0x18b6   :  { %v2615_v18 = vpop.xlane.xlu1 %2614 }
0x18b7   :  { %v2627_v19 = vrot.slane %v2615_v18, %v2622_v16  ;;  %v2612_v20 = vpop.xlane.xlu0 %2611 }
0x18b8   :  { %v2623_v21 = vrot.slane %v2612_v20, %v2622_v16 }
0x18ba   :  { %v2629_v23 = vsel %vm2628_vm12, %v2627_v19, %v2623_v21 }
0x18bb   :  { %v2607_v17 = vpop.xlane.xlu0 %2606 }
0x18bc   :  { %v2631_v24 = vmul.f32 %v2629_v23, %v2607_v17 }
0x18be   :  { %v2632_v25 = vmax.f32 %v2631_v24, 1e-16 }
0x18c0   :  { %3161 = vrsqrt.f32 %v2632_v25  ;;  %vm2635_vm13 = vcmp.eq.f32.partialorder %v2632_v25, inf  ;;  %v2638_v9 = vand.u32 2147483648, %v2632_v25  ;;  %vm2637_vm14 = vcmp.eq.f32.partialorder %v2632_v25, 0.0 }
0x18cd   :  { %v3162_v26 = vpop.eup %3161 }
0x18ce   :  { %v2634_v27 = vmul.f32 %v3162_v26, %v2632_v25 }
0x18d0   :  { %v2636_v30 = vsel %vm2635_vm13, %v2632_v25, %v2634_v27 }
0x18d1   :  { %v2639_v8 = vsel %vm2637_vm14, %v2638_v9, %v2636_v30 }
0x18d2   :  { %v2651_v35 = vrot.slane %v2639_v8, %v2650_v28  ;;  %v2644_v36 = vrot.slane %v2639_v8, %v2586_v4 }
0x18d4   :  { %2653 = vbcast.lane.b32.xlu0 %v2651_v35, 256  ;;  %2646 = vbcast.lane.b32.xlu1 %v2644_v36, 256 }
0x18f3   :  { %2601 = vadd.xlane.f32.xlu0 %v2600_v15 }
0x18f8   :  { %2598 = vadd.xlane.f32.xlu1 %v2597_v14 }
0x1946   :  { %v2654_v37 = vpop.permute.xlu0 %2653  ;;  %v2647_v40 = vpop.permute.xlu1 %2646 }
0x1947   :  { %3163 = vrcp.f32 %v2654_v37 }
0x1948   :  { %3165 = vrcp.f32 %v2647_v40 }
0x1954   :  { %v3164_v41 = vpop.eup %3163 }
0x1955   :  { %v3166_v45 = vpop.eup %3165 }
0x197c   :  { %v2602_v42 = vpop.xlane.xlu0 %2601 }
0x197d   :  { %v2660_v43 = vmul.f32 %v3164_v41, %v2602_v42 }
0x197f   :  { %2667 = vperm.xlu0 %3092, %v2660_v43  }
0x1981   :  { %v2599_v46 = vpop.xlane.xlu1 %2598 }
0x1982   :  { %v2658_v47 = vmul.f32 %v3166_v45, %v2599_v46 }
0x1984   :  { %2664 = vperm.xlu1 %3091, %v2658_v47  }
0x19fa   :  { %v2668_v39 = vpop.permute.xlu0 %2667 }
0x19fb   :  { %v2676_v50 = vrot.slane %v2668_v39, %v2622_v16 }
0x19ff   :  { %v2665_v49 = vpop.permute.xlu1 %2664 }
0x1a00   :  { %v2672_v51 = vrot.slane %v2665_v49, %v2622_v16 }
0x1a02   :  { %v2677_v52 = vsel %vm2628_vm12, %v2676_v50, %v2672_v51 }
0x1a03   :  { %2680 = vst.msk [vmem:[#allocation7] sm:$0x3] %vm2679_vm15, %v2677_v52 }
0x1a04   :  { %3190 = shalt.err (!%p3187_p9)
}
0x1a05   :  { %2690 = dma.vmem_to_hbm [thread:$0]  %s2688_s7, 32, %s3771_s17, [#allocation8]  }
0x1a06   :  { %3201 = dma.done.wait [#allocation8], 32  }
0x1a07   :  { %3202 = vsyncadd [#allocation8], 4294967264 }
0x1a08   :  { %2694 = vsyncpa [#allocation8], 1 }

</bundles_post_ra>
